<compile_context>
chip_gen: v6e
topology: v6e:2x2x1
jax: 0.10.0
libtpu: 0.0.40
codegen_flags: <defaults>
</compile_context>

<pallas_src>
import math

import jax
import jax.numpy as jnp
from jax.experimental import pallas as pl
from jax.experimental.pallas import tpu as pltpu


_VMEM_LIMIT = 32 * 1024 * 1024  # explicit scoped-VMEM budget, safe on v5e/v6e/v7x


# ----------------------------- Pallas kernels ------------------------------

def _make_conv_bn_relu_kernel(*, k, s, th, wo, with_proj):
    """y = relu(conv_kxk(x) + b)   [+ optional fused 1x1/stride-s projection].

    x_ref : (1, s*s, Hq, Wq, Cp)  polyphase-decomposed padded input (bf16)
    w_ref : (k*k, Cp, Co)         BN-scale-folded conv weights (bf16)
    b_ref : (1, Co)               folded BN bias (f32)
    [wsc_ref: (1, Cp, Co), bsc_ref: (1, Co)]
    o_ref : (1, th, Wo, Co)       output row-band
    [osc_ref: (1, th, Wo, Co)]    projection-shortcut output row-band
    """
    taps = [(kh, kw) for kh in range(k) for kw in range(k)]

    def kernel(x_ref, w_ref, b_ref, *rest):
        if with_proj:
            wsc_ref, bsc_ref, o_ref, osc_ref = rest
        else:
            (o_ref,) = rest
        row0 = pl.multiple_of(pl.program_id(1) * th, th)
        cp = x_ref.shape[-1]
        co = w_ref.shape[-1]

        acc = jnp.zeros((th * wo, co), jnp.float32)
        # Fixed 9-tap loop, fully unrolled (static offsets -> static slices on
        # the lane/sublane dims, only the row offset is dynamic).
        for t, (kh, kw) in enumerate(taps):
            p = (kh % s) * s + (kw % s)          # polyphase component
            oh, ow = kh // s, kw // s            # offset inside the phase
            xt = x_ref[0, p, pl.ds(row0 + oh, th), pl.ds(ow, wo), :]
            acc = acc + jnp.dot(xt.reshape(th * wo, cp), w_ref[t],
                                preferred_element_type=jnp.float32)
        out = jnp.maximum(acc + b_ref[...], 0.0)
        o_ref[0] = out.reshape(th, wo, co).astype(o_ref.dtype)

        if with_proj:
            # 1x1 stride-s conv reads x[i*s, j*s]; with pad=1 that is phase
            # ((1%s),(1%s)) at offset (1//s,1//s) of the same resident block.
            p = (1 % s) * s + (1 % s)
            off = 1 // s
            xs = x_ref[0, p, pl.ds(row0 + off, th), pl.ds(off, wo), :]
            sc = jnp.dot(xs.reshape(th * wo, cp), wsc_ref[0],
                         preferred_element_type=jnp.float32) + bsc_ref[...]
            osc_ref[0] = sc.reshape(th, wo, co).astype(osc_ref.dtype)

    return kernel


def _make_conv_bn_add_relu_kernel(*, k, th, wo):
    """out = relu(conv_3x3(y) + b + shortcut)   (stride 1)."""
    taps = [(kh, kw) for kh in range(k) for kw in range(k)]

    def kernel(y_ref, w_ref, b_ref, sc_ref, o_ref):
        row0 = pl.multiple_of(pl.program_id(1) * th, th)
        cp = y_ref.shape[-1]
        co = w_ref.shape[-1]
        acc = jnp.zeros((th * wo, co), jnp.float32)
        for t, (kh, kw) in enumerate(taps):
            xt = y_ref[0, 0, pl.ds(row0 + kh, th), pl.ds(kw, wo), :]
            acc = acc + jnp.dot(xt.reshape(th * wo, cp), w_ref[t],
                                preferred_element_type=jnp.float32)
        out = acc + b_ref[...] + sc_ref[0].reshape(th * wo, co).astype(jnp.float32)
        o_ref[0] = jnp.maximum(out, 0.0).reshape(th, wo, co).astype(o_ref.dtype)

    return kernel


# --------------------------- pallas_call wrappers ---------------------------

def _conv1_call(x_ph, w, b, wsc, bsc, *, k, s, ho, wo, th):
    n = x_ph.shape[0]
    sq, hq, wq, cp = x_ph.shape[1:]
    co = w.shape[-1]
    with_proj = wsc is not None
    kernel = _make_conv_bn_relu_kernel(k=k, s=s, th=th, wo=wo, with_proj=with_proj)

    in_specs = [
        # Full spatial window per batch element; same block across row tiles
        # so the pipeline does not re-fetch it.
        pl.BlockSpec((1, sq, hq, wq, cp), lambda n_, i: (n_, 0, 0, 0, 0)),
        pl.BlockSpec((k * k, cp, co), lambda n_, i: (0, 0, 0)),
        pl.BlockSpec((1, co), lambda n_, i: (0, 0)),
    ]
    band_spec = pl.BlockSpec((1, th, wo, co), lambda n_, i: (n_, i, 0, 0))
    args = [x_ph, w, b]
    if with_proj:
        in_specs += [pl.BlockSpec((1, cp, co), lambda n_, i: (0, 0, 0)),
                     pl.BlockSpec((1, co), lambda n_, i: (0, 0))]
        args += [wsc, bsc]
        out_shape = (jax.ShapeDtypeStruct((n, ho, wo, co), jnp.bfloat16),
                     jax.ShapeDtypeStruct((n, ho, wo, co), jnp.bfloat16))
        out_specs = (band_spec, band_spec)
    else:
        out_shape = jax.ShapeDtypeStruct((n, ho, wo, co), jnp.bfloat16)
        out_specs = band_spec

    return pl.pallas_call(
        kernel,
        out_shape=out_shape,
        grid=(n, ho // th),
        in_specs=in_specs,
        out_specs=out_specs,
        compiler_params=pltpu.CompilerParams(
            dimension_semantics=("parallel", "parallel"),
            vmem_limit_bytes=_VMEM_LIMIT),
    )(*args)


def _conv2_call(y_ph, w, b, sc, *, ho, wo, th):
    n = y_ph.shape[0]
    sq, hq, wq, cp = y_ph.shape[1:]
    co = w.shape[-1]
    kernel = _make_conv_bn_add_relu_kernel(k=3, th=th, wo=wo)
    return pl.pallas_call(
        kernel,
        out_shape=jax.ShapeDtypeStruct((n, ho, wo, co), jnp.float32),
        grid=(n, ho // th),
        in_specs=[
            pl.BlockSpec((1, sq, hq, wq, cp), lambda n_, i: (n_, 0, 0, 0, 0)),
            pl.BlockSpec((9, cp, co), lambda n_, i: (0, 0, 0)),
            pl.BlockSpec((1, co), lambda n_, i: (0, 0)),
            pl.BlockSpec((1, th, wo, co), lambda n_, i: (n_, i, 0, 0)),
        ],
        out_specs=pl.BlockSpec((1, th, wo, co), lambda n_, i: (n_, i, 0, 0)),
        compiler_params=pltpu.CompilerParams(
            dimension_semantics=("parallel", "parallel"),
            vmem_limit_bytes=_VMEM_LIMIT),
    )(y_ph, w, b, sc)


# ------------------------------- JAX glue -----------------------------------

def _round_up(x, m):
    return (x + m - 1) // m * m


def _polyphase(x_nhwc, *, k, stride, pad):
    """Zero-pad spatially, round H/W up to multiples of `stride`, and split
    into stride*stride polyphase components so every conv tap is a contiguous
    slice in-kernel.  Total size == padded input (no im2col blow-up)."""
    n, h, w, c = x_nhwc.shape
    hp, wp = h + 2 * pad, w + 2 * pad
    hq, wq = -(-hp // stride), -(-wp // stride)
    xp = jnp.pad(x_nhwc, ((0, 0),
                          (pad, pad + hq * stride - hp),
                          (pad, pad + wq * stride - wp),
                          (0, 0)))
    xp = xp.reshape(n, hq, stride, wq, stride, c)
    xp = jnp.transpose(xp, (0, 2, 4, 1, 3, 5))
    return xp.reshape(n, stride * stride, hq, wq, c)


def _fold_weight(w_oihw, bn_scale, cp, cop):
    """(Co,Ci,kh,kw) torch conv weight -> (kh*kw, Cp, Cop) bf16 with the BN
    scale folded into the output channels and zero padding to lane width."""
    co, ci, kh, kw = w_oihw.shape
    wf = w_oihw * bn_scale[:, None, None, None]
    wf = jnp.transpose(wf, (2, 3, 1, 0)).reshape(kh * kw, ci, co)
    wf = jnp.pad(wf, ((0, 0), (0, cp - ci), (0, cop - co)))
    return wf.astype(jnp.bfloat16)


def _pad_bias(b, cop):
    return jnp.pad(b, (0, cop - b.shape[0])).reshape(1, cop).astype(jnp.float32)


def _pick_row_tile(ho, wo, cop):
    """Largest divisor th of ho keeping the flattened matmul M = th*wo within a
    ~2 MiB f32 accumulator budget (bigger tiles -> fewer grid steps, bigger MXU
    M dim), clamped to [256, 2048] rows."""
    max_rows = min(2048, max(256, (2 * 1024 * 1024) // (4 * cop)))
    th = 1
    for cand in range(1, ho + 1):
        if ho % cand == 0 and cand * wo <= max_rows:
            th = cand
    return th


def _fold_bn(gamma, beta, mean, var, eps=1e-5):
    scale = gamma / jnp.sqrt(var + eps)
    return scale, beta - mean * scale


def init_block_params(key, cin, cout, stride):
    ks = jax.random.split(key, 8)

    def conv_w(k, co, ci, kk):
        fan_in = ci * kk * kk
        return jax.random.normal(k, (co, ci, kk, kk), jnp.float32) / math.sqrt(fan_in)

    def bn_folded(k, c):
        k1, k2, k3, k4 = jax.random.split(k, 4)
        gamma = 1.0 + 0.1 * jax.random.normal(k1, (c,), jnp.float32)
        beta = 0.1 * jax.random.normal(k2, (c,), jnp.float32)
        mean = 0.1 * jax.random.normal(k3, (c,), jnp.float32)
        var = 0.5 + 0.5 * jnp.abs(jax.random.normal(k4, (c,), jnp.float32))
        return _fold_bn(gamma, beta, mean, var)

    params = {"stride": stride}
    params["w1"] = conv_w(ks[0], cout, cin, 3)
    params["bn1_scale"], params["bn1_bias"] = bn_folded(ks[1], cout)
    params["w2"] = conv_w(ks[2], cout, cout, 3)
    params["bn2_scale"], params["bn2_bias"] = bn_folded(ks[3], cout)
    if stride != 1 or cin != cout:
        params["w_sc"] = conv_w(ks[4], cout, cin, 1)
        params["bnsc_scale"], params["bnsc_bias"] = bn_folded(ks[5], cout)
    return params


def block_forward(x_nchw, params):
    """Forward pass of the ResNet BasicBlock.  Input/output are NCHW (PyTorch)."""
    stride = params["stride"]
    # Boundary transposes kept only to honor the NCHW PyTorch interface; the
    # whole block runs in NHWC (channels on the lane axis).
    x = jnp.transpose(x_nchw, (0, 2, 3, 1))
    n, h, w, cin = x.shape
    cout = params["w1"].shape[0]
    cp = _round_up(cin, 128)
    cop = _round_up(cout, 128)

    # Lane-dense, bf16 activations (zero channel padding).
    x_cp = jnp.pad(x, ((0, 0), (0, 0), (0, 0), (0, cp - cin))).astype(jnp.bfloat16)

    ho = (h + 2 - 3) // stride + 1
    wo = (w + 2 - 3) // stride + 1
    th = _pick_row_tile(ho, wo, cop)

    # conv1 (3x3, stride) + bn1 + relu   [+ fused 1x1 projection shortcut]
    x_ph = _polyphase(x_cp, k=3, stride=stride, pad=1)
    w1 = _fold_weight(params["w1"], params["bn1_scale"], cp, cop)
    b1 = _pad_bias(params["bn1_bias"], cop)
    if "w_sc" in params:
        wsc = _fold_weight(params["w_sc"], params["bnsc_scale"], cp, cop)
        bsc = _pad_bias(params["bnsc_bias"], cop)
        y1, sc = _conv1_call(x_ph, w1, b1, wsc, bsc, k=3, s=stride,
                             ho=ho, wo=wo, th=th)
    else:
        y1 = _conv1_call(x_ph, w1, b1, None, None, k=3, s=stride,
                         ho=ho, wo=wo, th=th)
        sc = x_cp  # identity shortcut (stride == 1, cin == cout -> cp == cop)

    # conv2 (3x3, stride 1) + bn2 + residual add + relu  (single fused kernel,
    # reading y1 directly in NHWC — no im2col round-trip).
    y_ph = _polyphase(y1, k=3, stride=1, pad=1)
    w2 = _fold_weight(params["w2"], params["bn2_scale"], cop, cop)
    b2 = _pad_bias(params["bn2_bias"], cop)
    out = _conv2_call(y_ph, w2, b2, sc, ho=ho, wo=wo, th=th)

    out = out[..., :cout]
    return jnp.transpose(out, (0, 3, 1, 2))


# --------------------------- pure-JAX reference ------------------------------

def ref_block(x_nchw, params):
    stride = params["stride"]

    def conv(x, w, s, pad):
        return jax.lax.conv_general_dilated(
            x, w, window_strides=(s, s), padding=((pad, pad), (pad, pad)),
            dimension_numbers=("NCHW", "OIHW", "NCHW"))

    def affine(x, scale, bias):
        return x * scale[None, :, None, None] + bias[None, :, None, None]

    out = jax.nn.relu(affine(conv(x_nchw, params["w1"], stride, 1),
                             params["bn1_scale"], params["bn1_bias"]))
    out = affine(conv(out, params["w2"], 1, 1),
                 params["bn2_scale"], params["bn2_bias"])
    if "w_sc" in params:
        sc = affine(conv(x_nchw, params["w_sc"], stride, 0),
                    params["bnsc_scale"], params["bnsc_bias"])
    else:
        sc = x_nchw
    return jax.nn.relu(out + sc)


# ----------------------------------- main ------------------------------------

if __name__ == "__main__":
    key = jax.random.PRNGKey(0)
    kx, kp1, kp2 = jax.random.split(key, 3)

    # NCHW input, like the PyTorch module.
    x = jax.random.normal(kx, (2, 4, 16, 16), jnp.float32)

    # Case A: projection shortcut (stride=2, channel change 4 -> 8).
    params_a = init_block_params(kp1, 4, 8, 2)
    out_a = jax.block_until_ready(block_forward(x, params_a))
    ref_a = ref_block(x, params_a)
    assert out_a.shape == (2, 8, 8, 8), out_a.shape
    err_a = float(jnp.max(jnp.abs(out_a - ref_a)))
    # bf16 matmul operands vs f32 reference -> tolerance sized for bf16.
    assert jnp.allclose(out_a, ref_a, atol=5e-2, rtol=5e-2), err_a

    # Case B: identity shortcut (stride=1, 8 -> 8 channels).
    params_b = init_block_params(kp2, 8, 8, 1)
    x_b = ref_a
    out_b = jax.block_until_ready(block_forward(x_b, params_b))
    ref_b = ref_block(x_b, params_b)
    assert out_b.shape == (2, 8, 8, 8), out_b.shape
    err_b = float(jnp.max(jnp.abs(out_b - ref_b)))
    assert jnp.allclose(out_b, ref_b, atol=5e-2, rtol=5e-2), err_b

    print("KERNEL_OK")
</pallas_src>

<mosaic_0001>
module attributes {stable_mosaic.version = 11 : i64} {
  func.func @kernel(%arg0: i32, %arg1: i32, %arg2: memref<1x4x9x9x128xbf16, #tpu.memory_space<vmem>>, %arg3: memref<9x128x128xbf16, #tpu.memory_space<vmem>>, %arg4: memref<1x128xf32, #tpu.memory_space<vmem>>, %arg5: memref<1x128x128xbf16, #tpu.memory_space<vmem>>, %arg6: memref<1x128xf32, #tpu.memory_space<vmem>>, %arg7: memref<1x8x8x128xbf16, #tpu.memory_space<vmem>>, %arg8: memref<1x8x8x128xbf16, #tpu.memory_space<vmem>>) attributes {dimension_semantics = [#tpu.dimension_semantics<parallel>, #tpu.dimension_semantics<parallel>], iteration_bounds = array<i64: 2, 1>, scalar_prefetch = 0 : i64, scratch_operands = 0 : i64, tpu.core_type = #tpu.core_type<tc>, window_params = [{transform_indices = @transform_0, window_bounds = array<i64: 1, 4, 9, 9, 128>}, {pipeline_mode = #tpu.pipeline_mode<synchronous>, transform_indices = @transform_1, window_bounds = array<i64: 9, 128, 128>}, {pipeline_mode = #tpu.pipeline_mode<synchronous>, transform_indices = @transform_2, window_bounds = array<i64: 1, 128>}, {pipeline_mode = #tpu.pipeline_mode<synchronous>, transform_indices = @transform_3, window_bounds = array<i64: 1, 128, 128>}, {pipeline_mode = #tpu.pipeline_mode<synchronous>, transform_indices = @transform_4, window_bounds = array<i64: 1, 128>}, {transform_indices = @transform_5, window_bounds = array<i64: 1, 8, 8, 128>}, {transform_indices = @transform_6, window_bounds = array<i64: 1, 8, 8, 128>}]} {
    %c8_i32 = arith.constant 8 : i32
    %0 = arith.muli %arg1, %c8_i32 : i32
    %1 = tpu.assume_multiple %0, 8 : i32
    %cst = arith.constant 0.000000e+00 : f32
    %2 = vector.broadcast %cst : f32 to vector<64x128xf32>
    %c0_i32 = arith.constant 0 : i32
    %3 = arith.addi %1, %c0_i32 : i32
    %c0 = arith.constant 0 : index
    %c0_0 = arith.constant 0 : index
    %4 = arith.index_cast %3 : i32 to index
    %c0_1 = arith.constant 0 : index
    %c0_2 = arith.constant 0 : index
    %5 = vector.load %arg2[%c0, %c0_0, %4, %c0_1, %c0_2] : memref<1x4x9x9x128xbf16, #tpu.memory_space<vmem>>, vector<1x1x8x8x128xbf16>
    %6 = vector.shape_cast %5 : vector<1x1x8x8x128xbf16> to vector<8x8x128xbf16>
    %7 = vector.shape_cast %6 : vector<8x8x128xbf16> to vector<64x128xbf16>
    %c0_3 = arith.constant 0 : index
    %c0_4 = arith.constant 0 : index
    %c0_5 = arith.constant 0 : index
    %8 = vector.load %arg3[%c0_3, %c0_4, %c0_5] : memref<9x128x128xbf16, #tpu.memory_space<vmem>>, vector<1x128x128xbf16>
    %9 = vector.shape_cast %8 : vector<1x128x128xbf16> to vector<128x128xbf16>
    %cst_6 = arith.constant dense<0.000000e+00> : vector<64x128xf32>
    %10 = tpu.matmul %7, %9, %cst_6 {dimension_numbers = #tpu.dot_dimension_numbers<[1], [0], [0], [1], [0, 0, 1, 1], [], []>} : vector<64x128xbf16>, vector<128x128xbf16>, vector<64x128xf32> -> vector<64x128xf32>
    %11 = arith.addf %2, %10 : vector<64x128xf32>
    %c0_i32_7 = arith.constant 0 : i32
    %12 = arith.addi %1, %c0_i32_7 : i32
    %c0_8 = arith.constant 0 : index
    %c1 = arith.constant 1 : index
    %13 = arith.index_cast %12 : i32 to index
    %c0_9 = arith.constant 0 : index
    %c0_10 = arith.constant 0 : index
    %14 = vector.load %arg2[%c0_8, %c1, %13, %c0_9, %c0_10] : memref<1x4x9x9x128xbf16, #tpu.memory_space<vmem>>, vector<1x1x8x8x128xbf16>
    %15 = vector.shape_cast %14 : vector<1x1x8x8x128xbf16> to vector<8x8x128xbf16>
    %16 = vector.shape_cast %15 : vector<8x8x128xbf16> to vector<64x128xbf16>
    %c1_11 = arith.constant 1 : index
    %c0_12 = arith.constant 0 : index
    %c0_13 = arith.constant 0 : index
    %17 = vector.load %arg3[%c1_11, %c0_12, %c0_13] : memref<9x128x128xbf16, #tpu.memory_space<vmem>>, vector<1x128x128xbf16>
    %18 = vector.shape_cast %17 : vector<1x128x128xbf16> to vector<128x128xbf16>
    %cst_14 = arith.constant dense<0.000000e+00> : vector<64x128xf32>
    %19 = tpu.matmul %16, %18, %cst_14 {dimension_numbers = #tpu.dot_dimension_numbers<[1], [0], [0], [1], [0, 0, 1, 1], [], []>} : vector<64x128xbf16>, vector<128x128xbf16>, vector<64x128xf32> -> vector<64x128xf32>
    %20 = arith.addf %11, %19 : vector<64x128xf32>
    %c0_i32_15 = arith.constant 0 : i32
    %21 = arith.addi %1, %c0_i32_15 : i32
    %c0_16 = arith.constant 0 : index
    %c0_17 = arith.constant 0 : index
    %22 = arith.index_cast %21 : i32 to index
    %c1_18 = arith.constant 1 : index
    %c0_19 = arith.constant 0 : index
    %23 = vector.load %arg2[%c0_16, %c0_17, %22, %c1_18, %c0_19] : memref<1x4x9x9x128xbf16, #tpu.memory_space<vmem>>, vector<1x1x8x8x128xbf16>
    %24 = vector.shape_cast %23 : vector<1x1x8x8x128xbf16> to vector<8x8x128xbf16>
    %25 = vector.shape_cast %24 : vector<8x8x128xbf16> to vector<64x128xbf16>
    %c2 = arith.constant 2 : index
    %c0_20 = arith.constant 0 : index
    %c0_21 = arith.constant 0 : index
    %26 = vector.load %arg3[%c2, %c0_20, %c0_21] : memref<9x128x128xbf16, #tpu.memory_space<vmem>>, vector<1x128x128xbf16>
    %27 = vector.shape_cast %26 : vector<1x128x128xbf16> to vector<128x128xbf16>
    %cst_22 = arith.constant dense<0.000000e+00> : vector<64x128xf32>
    %28 = tpu.matmul %25, %27, %cst_22 {dimension_numbers = #tpu.dot_dimension_numbers<[1], [0], [0], [1], [0, 0, 1, 1], [], []>} : vector<64x128xbf16>, vector<128x128xbf16>, vector<64x128xf32> -> vector<64x128xf32>
    %29 = arith.addf %20, %28 : vector<64x128xf32>
    %c0_i32_23 = arith.constant 0 : i32
    %30 = arith.addi %1, %c0_i32_23 : i32
    %c0_24 = arith.constant 0 : index
    %c2_25 = arith.constant 2 : index
    %31 = arith.index_cast %30 : i32 to index
    %c0_26 = arith.constant 0 : index
    %c0_27 = arith.constant 0 : index
    %32 = vector.load %arg2[%c0_24, %c2_25, %31, %c0_26, %c0_27] : memref<1x4x9x9x128xbf16, #tpu.memory_space<vmem>>, vector<1x1x8x8x128xbf16>
    %33 = vector.shape_cast %32 : vector<1x1x8x8x128xbf16> to vector<8x8x128xbf16>
    %34 = vector.shape_cast %33 : vector<8x8x128xbf16> to vector<64x128xbf16>
    %c3 = arith.constant 3 : index
    %c0_28 = arith.constant 0 : index
    %c0_29 = arith.constant 0 : index
    %35 = vector.load %arg3[%c3, %c0_28, %c0_29] : memref<9x128x128xbf16, #tpu.memory_space<vmem>>, vector<1x128x128xbf16>
    %36 = vector.shape_cast %35 : vector<1x128x128xbf16> to vector<128x128xbf16>
    %cst_30 = arith.constant dense<0.000000e+00> : vector<64x128xf32>
    %37 = tpu.matmul %34, %36, %cst_30 {dimension_numbers = #tpu.dot_dimension_numbers<[1], [0], [0], [1], [0, 0, 1, 1], [], []>} : vector<64x128xbf16>, vector<128x128xbf16>, vector<64x128xf32> -> vector<64x128xf32>
    %38 = arith.addf %29, %37 : vector<64x128xf32>
    %c0_i32_31 = arith.constant 0 : i32
    %39 = arith.addi %1, %c0_i32_31 : i32
    %c0_32 = arith.constant 0 : index
    %c3_33 = arith.constant 3 : index
    %40 = arith.index_cast %39 : i32 to index
    %c0_34 = arith.constant 0 : index
    %c0_35 = arith.constant 0 : index
    %41 = vector.load %arg2[%c0_32, %c3_33, %40, %c0_34, %c0_35] : memref<1x4x9x9x128xbf16, #tpu.memory_space<vmem>>, vector<1x1x8x8x128xbf16>
    %42 = vector.shape_cast %41 : vector<1x1x8x8x128xbf16> to vector<8x8x128xbf16>
    %43 = vector.shape_cast %42 : vector<8x8x128xbf16> to vector<64x128xbf16>
    %c4 = arith.constant 4 : index
    %c0_36 = arith.constant 0 : index
    %c0_37 = arith.constant 0 : index
    %44 = vector.load %arg3[%c4, %c0_36, %c0_37] : memref<9x128x128xbf16, #tpu.memory_space<vmem>>, vector<1x128x128xbf16>
    %45 = vector.shape_cast %44 : vector<1x128x128xbf16> to vector<128x128xbf16>
    %cst_38 = arith.constant dense<0.000000e+00> : vector<64x128xf32>
    %46 = tpu.matmul %43, %45, %cst_38 {dimension_numbers = #tpu.dot_dimension_numbers<[1], [0], [0], [1], [0, 0, 1, 1], [], []>} : vector<64x128xbf16>, vector<128x128xbf16>, vector<64x128xf32> -> vector<64x128xf32>
    %47 = arith.addf %38, %46 : vector<64x128xf32>
    %c0_i32_39 = arith.constant 0 : i32
    %48 = arith.addi %1, %c0_i32_39 : i32
    %c0_40 = arith.constant 0 : index
    %c2_41 = arith.constant 2 : index
    %49 = arith.index_cast %48 : i32 to index
    %c1_42 = arith.constant 1 : index
    %c0_43 = arith.constant 0 : index
    %50 = vector.load %arg2[%c0_40, %c2_41, %49, %c1_42, %c0_43] : memref<1x4x9x9x128xbf16, #tpu.memory_space<vmem>>, vector<1x1x8x8x128xbf16>
    %51 = vector.shape_cast %50 : vector<1x1x8x8x128xbf16> to vector<8x8x128xbf16>
    %52 = vector.shape_cast %51 : vector<8x8x128xbf16> to vector<64x128xbf16>
    %c5 = arith.constant 5 : index
    %c0_44 = arith.constant 0 : index
    %c0_45 = arith.constant 0 : index
    %53 = vector.load %arg3[%c5, %c0_44, %c0_45] : memref<9x128x128xbf16, #tpu.memory_space<vmem>>, vector<1x128x128xbf16>
    %54 = vector.shape_cast %53 : vector<1x128x128xbf16> to vector<128x128xbf16>
    %cst_46 = arith.constant dense<0.000000e+00> : vector<64x128xf32>
    %55 = tpu.matmul %52, %54, %cst_46 {dimension_numbers = #tpu.dot_dimension_numbers<[1], [0], [0], [1], [0, 0, 1, 1], [], []>} : vector<64x128xbf16>, vector<128x128xbf16>, vector<64x128xf32> -> vector<64x128xf32>
    %56 = arith.addf %47, %55 : vector<64x128xf32>
    %c1_i32 = arith.constant 1 : i32
    %57 = arith.addi %1, %c1_i32 : i32
    %c0_47 = arith.constant 0 : index
    %c0_48 = arith.constant 0 : index
    %58 = arith.index_cast %57 : i32 to index
    %c0_49 = arith.constant 0 : index
    %c0_50 = arith.constant 0 : index
    %59 = vector.load %arg2[%c0_47, %c0_48, %58, %c0_49, %c0_50] : memref<1x4x9x9x128xbf16, #tpu.memory_space<vmem>>, vector<1x1x8x8x128xbf16>
    %60 = vector.shape_cast %59 : vector<1x1x8x8x128xbf16> to vector<8x8x128xbf16>
    %61 = vector.shape_cast %60 : vector<8x8x128xbf16> to vector<64x128xbf16>
    %c6 = arith.constant 6 : index
    %c0_51 = arith.constant 0 : index
    %c0_52 = arith.constant 0 : index
    %62 = vector.load %arg3[%c6, %c0_51, %c0_52] : memref<9x128x128xbf16, #tpu.memory_space<vmem>>, vector<1x128x128xbf16>
    %63 = vector.shape_cast %62 : vector<1x128x128xbf16> to vector<128x128xbf16>
    %cst_53 = arith.constant dense<0.000000e+00> : vector<64x128xf32>
    %64 = tpu.matmul %61, %63, %cst_53 {dimension_numbers = #tpu.dot_dimension_numbers<[1], [0], [0], [1], [0, 0, 1, 1], [], []>} : vector<64x128xbf16>, vector<128x128xbf16>, vector<64x128xf32> -> vector<64x128xf32>
    %65 = arith.addf %56, %64 : vector<64x128xf32>
    %c1_i32_54 = arith.constant 1 : i32
    %66 = arith.addi %1, %c1_i32_54 : i32
    %c0_55 = arith.constant 0 : index
    %c1_56 = arith.constant 1 : index
    %67 = arith.index_cast %66 : i32 to index
    %c0_57 = arith.constant 0 : index
    %c0_58 = arith.constant 0 : index
    %68 = vector.load %arg2[%c0_55, %c1_56, %67, %c0_57, %c0_58] : memref<1x4x9x9x128xbf16, #tpu.memory_space<vmem>>, vector<1x1x8x8x128xbf16>
    %69 = vector.shape_cast %68 : vector<1x1x8x8x128xbf16> to vector<8x8x128xbf16>
    %70 = vector.shape_cast %69 : vector<8x8x128xbf16> to vector<64x128xbf16>
    %c7 = arith.constant 7 : index
    %c0_59 = arith.constant 0 : index
    %c0_60 = arith.constant 0 : index
    %71 = vector.load %arg3[%c7, %c0_59, %c0_60] : memref<9x128x128xbf16, #tpu.memory_space<vmem>>, vector<1x128x128xbf16>
    %72 = vector.shape_cast %71 : vector<1x128x128xbf16> to vector<128x128xbf16>
    %cst_61 = arith.constant dense<0.000000e+00> : vector<64x128xf32>
    %73 = tpu.matmul %70, %72, %cst_61 {dimension_numbers = #tpu.dot_dimension_numbers<[1], [0], [0], [1], [0, 0, 1, 1], [], []>} : vector<64x128xbf16>, vector<128x128xbf16>, vector<64x128xf32> -> vector<64x128xf32>
    %74 = arith.addf %65, %73 : vector<64x128xf32>
    %c1_i32_62 = arith.constant 1 : i32
    %75 = arith.addi %1, %c1_i32_62 : i32
    %c0_63 = arith.constant 0 : index
    %c0_64 = arith.constant 0 : index
    %76 = arith.index_cast %75 : i32 to index
    %c1_65 = arith.constant 1 : index
    %c0_66 = arith.constant 0 : index
    %77 = vector.load %arg2[%c0_63, %c0_64, %76, %c1_65, %c0_66] : memref<1x4x9x9x128xbf16, #tpu.memory_space<vmem>>, vector<1x1x8x8x128xbf16>
    %78 = vector.shape_cast %77 : vector<1x1x8x8x128xbf16> to vector<8x8x128xbf16>
    %79 = vector.shape_cast %78 : vector<8x8x128xbf16> to vector<64x128xbf16>
    %c8 = arith.constant 8 : index
    %c0_67 = arith.constant 0 : index
    %c0_68 = arith.constant 0 : index
    %80 = vector.load %arg3[%c8, %c0_67, %c0_68] : memref<9x128x128xbf16, #tpu.memory_space<vmem>>, vector<1x128x128xbf16>
    %81 = vector.shape_cast %80 : vector<1x128x128xbf16> to vector<128x128xbf16>
    %cst_69 = arith.constant dense<0.000000e+00> : vector<64x128xf32>
    %82 = tpu.matmul %79, %81, %cst_69 {dimension_numbers = #tpu.dot_dimension_numbers<[1], [0], [0], [1], [0, 0, 1, 1], [], []>} : vector<64x128xbf16>, vector<128x128xbf16>, vector<64x128xf32> -> vector<64x128xf32>
    %83 = arith.addf %74, %82 : vector<64x128xf32>
    %c0_70 = arith.constant 0 : index
    %c0_71 = arith.constant 0 : index
    %84 = vector.load %arg4[%c0_70, %c0_71] : memref<1x128xf32, #tpu.memory_space<vmem>>, vector<1x128xf32>
    %85 = vector.broadcast %84 : vector<1x128xf32> to vector<64x128xf32>
    %86 = arith.addf %83, %85 : vector<64x128xf32>
    %cst_72 = arith.constant 0.000000e+00 : f32
    %87 = vector.broadcast %cst_72 : f32 to vector<64x128xf32>
    %88 = arith.maximumf %86, %87 : vector<64x128xf32>
    %89 = vector.shape_cast %88 : vector<64x128xf32> to vector<8x8x128xf32>
    %90 = arith.truncf %89 : vector<8x8x128xf32> to vector<8x8x128xbf16>
    %c0_73 = arith.constant 0 : index
    %c0_74 = arith.constant 0 : index
    %c0_75 = arith.constant 0 : index
    %c0_76 = arith.constant 0 : index
    %91 = vector.load %arg7[%c0_73, %c0_74, %c0_75, %c0_76] : memref<1x8x8x128xbf16, #tpu.memory_space<vmem>>, vector<1x8x8x128xbf16>
    %92 = vector.shape_cast %91 : vector<1x8x8x128xbf16> to vector<8x8x128xbf16>
    %93 = vector.shape_cast %90 : vector<8x8x128xbf16> to vector<1x8x8x128xbf16>
    tpu.vector_store %arg7[%c0_73, %c0_74, %c0_75, %c0_76], %93 {strides = array<i32>} : memref<1x8x8x128xbf16, #tpu.memory_space<vmem>>, vector<1x8x8x128xbf16>,
    %c0_i32_77 = arith.constant 0 : i32
    %94 = arith.addi %1, %c0_i32_77 : i32
    %c0_78 = arith.constant 0 : index
    %c3_79 = arith.constant 3 : index
    %95 = arith.index_cast %94 : i32 to index
    %c0_80 = arith.constant 0 : index
    %c0_81 = arith.constant 0 : index
    %96 = vector.load %arg2[%c0_78, %c3_79, %95, %c0_80, %c0_81] : memref<1x4x9x9x128xbf16, #tpu.memory_space<vmem>>, vector<1x1x8x8x128xbf16>
    %97 = vector.shape_cast %96 : vector<1x1x8x8x128xbf16> to vector<8x8x128xbf16>
    %98 = vector.shape_cast %97 : vector<8x8x128xbf16> to vector<64x128xbf16>
    %c0_82 = arith.constant 0 : index
    %c0_83 = arith.constant 0 : index
    %c0_84 = arith.constant 0 : index
    %99 = vector.load %arg5[%c0_82, %c0_83, %c0_84] : memref<1x128x128xbf16, #tpu.memory_space<vmem>>, vector<1x128x128xbf16>
    %100 = vector.shape_cast %99 : vector<1x128x128xbf16> to vector<128x128xbf16>
    %cst_85 = arith.constant dense<0.000000e+00> : vector<64x128xf32>
    %101 = tpu.matmul %98, %100, %cst_85 {dimension_numbers = #tpu.dot_dimension_numbers<[1], [0], [0], [1], [0, 0, 1, 1], [], []>} : vector<64x128xbf16>, vector<128x128xbf16>, vector<64x128xf32> -> vector<64x128xf32>
    %c0_86 = arith.constant 0 : index
    %c0_87 = arith.constant 0 : index
    %102 = vector.load %arg6[%c0_86, %c0_87] : memref<1x128xf32, #tpu.memory_space<vmem>>, vector<1x128xf32>
    %103 = vector.broadcast %102 : vector<1x128xf32> to vector<64x128xf32>
    %104 = arith.addf %101, %103 : vector<64x128xf32>
    %105 = vector.shape_cast %104 : vector<64x128xf32> to vector<8x8x128xf32>
    %106 = arith.truncf %105 : vector<8x8x128xf32> to vector<8x8x128xbf16>
    %c0_88 = arith.constant 0 : index
    %c0_89 = arith.constant 0 : index
    %c0_90 = arith.constant 0 : index
    %c0_91 = arith.constant 0 : index
    %107 = vector.load %arg8[%c0_88, %c0_89, %c0_90, %c0_91] : memref<1x8x8x128xbf16, #tpu.memory_space<vmem>>, vector<1x8x8x128xbf16>
    %108 = vector.shape_cast %107 : vector<1x8x8x128xbf16> to vector<8x8x128xbf16>
    %109 = vector.shape_cast %106 : vector<8x8x128xbf16> to vector<1x8x8x128xbf16>
    tpu.vector_store %arg8[%c0_88, %c0_89, %c0_90, %c0_91], %109 {strides = array<i32>} : memref<1x8x8x128xbf16, #tpu.memory_space<vmem>>, vector<1x8x8x128xbf16>,
    return
  }
  func.func @transform_0(%arg0: i32, %arg1: i32) -> (i32, i32, i32, i32, i32) {
    %c0_i32 = arith.constant 0 : i32
    %c0_i32_0 = arith.constant 0 : i32
    %c0_i32_1 = arith.constant 0 : i32
    %c0_i32_2 = arith.constant 0 : i32
    %c0_i32_3 = arith.constant 0 : i32
    return %arg0, %c0_i32, %c0_i32_0, %c0_i32_1, %c0_i32_2 : i32, i32, i32, i32, i32
  }
  func.func @transform_1(%arg0: i32, %arg1: i32) -> (i32, i32, i32) {
    %c0_i32 = arith.constant 0 : i32
    %c0_i32_0 = arith.constant 0 : i32
    %c0_i32_1 = arith.constant 0 : i32
    %c0_i32_2 = arith.constant 0 : i32
    return %c0_i32, %c0_i32_0, %c0_i32_1 : i32, i32, i32
  }
  func.func @transform_2(%arg0: i32, %arg1: i32) -> (i32, i32) {
    %c0_i32 = arith.constant 0 : i32
    %c0_i32_0 = arith.constant 0 : i32
    %c0_i32_1 = arith.constant 0 : i32
    return %c0_i32, %c0_i32_0 : i32, i32
  }
  func.func @transform_3(%arg0: i32, %arg1: i32) -> (i32, i32, i32) {
    %c0_i32 = arith.constant 0 : i32
    %c0_i32_0 = arith.constant 0 : i32
    %c0_i32_1 = arith.constant 0 : i32
    %c0_i32_2 = arith.constant 0 : i32
    return %c0_i32, %c0_i32_0, %c0_i32_1 : i32, i32, i32
  }
  func.func @transform_4(%arg0: i32, %arg1: i32) -> (i32, i32) {
    %c0_i32 = arith.constant 0 : i32
    %c0_i32_0 = arith.constant 0 : i32
    %c0_i32_1 = arith.constant 0 : i32
    return %c0_i32, %c0_i32_0 : i32, i32
  }
  func.func @transform_5(%arg0: i32, %arg1: i32) -> (i32, i32, i32, i32) {
    %c0_i32 = arith.constant 0 : i32
    %c0_i32_0 = arith.constant 0 : i32
    %c0_i32_1 = arith.constant 0 : i32
    return %arg0, %arg1, %c0_i32, %c0_i32_0 : i32, i32, i32, i32
  }
  func.func @transform_6(%arg0: i32, %arg1: i32) -> (i32, i32, i32, i32) {
    %c0_i32 = arith.constant 0 : i32
    %c0_i32_0 = arith.constant 0 : i32
    %c0_i32_1 = arith.constant 0 : i32
    return %arg0, %arg1, %c0_i32, %c0_i32_0 : i32, i32, i32, i32
  }
}

</mosaic_0001>

<bundles_post_ra>
// kernel: tpu_custom_call.1
= control target key start
LH: loop header
LB: loop body
LE: loop exit
PB: predicated region body
PF: predicated region fallthrough
CT: control target
= control target key end

     0   :  { %12 = vsyncpa [#allocation3], 0  ;;  %s4217_s0 = inlined_call_operand.vmem [shape: bf16[2,4,9,9,128], index: 0, kind: input, shape index: {}]   ;;  %s4218_s1 = inlined_call_operand.vmem [shape: bf16[9,128,128], index: 1, kind: input, shape index: {}]   ;;  %s4219_s2 = inlined_call_operand.vmem [shape: f32[1,128], index: 2, kind: input, shape index: {}]   ;;  %s4220_s3 = inlined_call_operand.vmem [shape: bf16[1,128,128], index: 3, kind: input, shape index: {}]   ;;  %s4221_s4 = inlined_call_operand.vmem [shape: f32[1,128], index: 4, kind: input, shape index: {}]   ;;  %s4222_s5 = inlined_call_operand.hbm [shape: bf16[2,8,8,128], index: 5, kind: output, shape index: {0}]   ;;  %s4223_s6 = inlined_call_operand.hbm [shape: bf16[2,8,8,128], index: 6, kind: output, shape index: {1}]  }
   0x1   :  { %14 = vsyncpa [#allocation3 + $0x1], 0 }
   0x2   :  { %15 = vsyncpa [#allocation5], 0 }
   0x3   :  { %17 = vsyncpa [#allocation5 + $0x1], 0  ;;  %s3617_s21 = smov 0   ;;  %s3619_s22 = smov 0  }
   0x4   :  { %s3621_s23 = smov 0   ;;  %s3623_s24 = smov 0  }
   0x5   :  { %s3625_s25 = smov 0   ;;  %s3627_s26 = smov 0  }
   0x6 LB: > { %s2545_s27 = sadd.s32 4294967295, %s3576_s26   ;;  %s2546_s28 = sadd.s32 4294967294, %s3576_s26   ;;  %s3576_s26 = sphi %s3627_s26, %s23_s26   ;;  %s3572_s25 = sphi %s3625_s25, %s4249_s25   ;;  %s3568_s24 = sphi %s3623_s24, %s4248_s24   ;;  %s3564_s23 = sphi %s3621_s23, %s4247_s23   ;;  %s3560_s22 = sphi %s3619_s22, %s4246_s22   ;;  %s3556_s21 = sphi %s3617_s21, %s4245_s21  }
   0x7   : > { %s35_s29 = sadd.s32 1, %s3572_s25  ;;  %s154_s30 = sadd.s32 1, %s3564_s23 }
   0x8   : > { %p37_p0 = scmp.ge.s32.totalorder %s35_s29, 2  ;;  %p164_p1 = scmp.ne.s32.totalorder %s3564_s23, %s3560_s22 }
   0x9   : > { %p165_p2 = scmp.eq.s32.totalorder %s2545_s27, 1  ;;  %p170_p3 = scmp.ne.s32.totalorder %s3560_s22, %s3556_s21 }
   0xa   : > { %s4251_s29 = smov (%p37_p0, %s35_s29), 0  ;;  %p171_p5 = scmp.eq.s32.totalorder %s2546_s28, 1 }
   0xb   : > { %p3657_p4 = por %p165_p2, %p164_p1  ;;  %s149_s8 = ssub.s32 %s3572_s25, %s4251_s29 }
   0xc   : > { %p2549_p6 = scmp.ge.s32.totalorder %s3576_s26, 1  ;;  %p152_p7 = scmp.eq.s32.totalorder %s149_s8, 0 }
   0xd   : > { %p3664_p8 = por %p171_p5, %p170_p3  ;;  %p237_p9 = scmp.lt.s32.totalorder %s3576_s26, 3 }
   0xe   : > { %s3670_s10 = scalar_select %p152_p7, %s3564_s23, %s154_s30  }
   0xf   : > { %p238_p10 = pnand %p2549_p6, %p237_p9 }
  0x11   : > { %241 = sbr.rel (%p238_p10) target bundleno = 432 (0x1b0), region = 40 }
  0x16   : > { %v3362_v0 = vld [vmem:[%s4218_s1 + $0x78] sm:$0xff]   ;;  %p272_p11 = scmp.lt.s32.totalorder %s3568_s24, 1  ;;  %v3364_v2 = vld [vmem:[%s4218_s1 + $0x70] sm:$0xff]   ;;  %v3366_v4 = vld [vmem:[%s4218_s1 + $0x68] sm:$0xff]   ;;  %vm626_vm0 = vsmask.f32 3328 }
  0x17   : > { %v3363_v1 = vld [vmem:[%s4218_s1 + $0x38] sm:$0xff]   ;;  %3059 = vmatprep.subr.bf16.mxu0 %v3362_v0  ;;  %v3365_v3 = vld [vmem:[%s4218_s1 + $0x30] sm:$0xff]   ;;  %v3367_v5 = vld [vmem:[%s4218_s1 + $0x28] sm:$0xff]   ;;  %vm627_vm1 = vsmask.f32 7440  ;;  %s4083_s19 = sand.u32 1, %s3560_s22  }
  0x18   : > { %3083 = vmatprep.subr.bf16.mxu1 %v3363_v1  ;;  %3060 = vmatpush3.bf16.msra.mxu0 %v3362_v0  ;;  %s273_s30 = scalar_select %p272_p11, %s3568_s24, 1  ;;  %v3368_v6 = vld [vmem:[%s4218_s1 + $0x60] sm:$0xff]   ;;  %v3370_v8 = vld [vmem:[%s4218_s1 + $0x58] sm:$0xff]   ;;  %v3372_v10 = vld [vmem:[%s4218_s1 + $0x50] sm:$0xff]  }
  0x19   : > { %3084 = vmatpush3.bf16.msra.mxu1 %v3363_v1  ;;  %3061 = vmatprep.subr.bf16.mxu0 %v3364_v2  ;;  %v3369_v7 = vld [vmem:[%s4218_s1 + $0x20] sm:$0xff]   ;;  %v3371_v9 = vld [vmem:[%s4218_s1 + $0x18] sm:$0xff]   ;;  %v3373_v11 = vld [vmem:[%s4218_s1 + $0x10] sm:$0xff]   ;;  %s2550_s8 = sshll.u32 %s4083_s19, 5  ;;  %s2891_s13 = sshll.u32 %s3568_s24, 9 }
  0x1a   : > { %3085 = vmatprep.subr.bf16.mxu1 %v3365_v3  ;;  %s3299_s14 = smul.u32 288, %s273_s30  ;;  %v3374_v14 = vld [vmem:[%s4218_s1 + $0x48] sm:$0xff]   ;;  %v3376_v16 = vld [vmem:[%s4218_s1 + $0x40] sm:$0xff]   ;;  %v3382_v19 = vld [vmem:[%s4218_s1 + $0xb8] sm:$0xff]   ;;  %s4106_s30 = scalar_lea.vmem [#allocation4], %s2550_s8 }
  0x1b   : > { %v3375_v15 = vld [vmem:[%s4218_s1 + $0x8] sm:$0xff]   ;;  %v3377_v17 = vld [vmem:[%s4218_s1] sm:$0xff]   ;;  %v3383_v20 = vld [vmem:[%s4218_s1 + $0xf8] sm:$0xff]   ;;  %s4113_s11 = scalar_lea.vmem [#allocation2], %s2550_s8  ;;  %s2414_s12 = sshll.u32 %s4106_s30, 4  ;;  %s4126_s12 = int_to_ptr.vmem [resolvable:$true] %s2414_s12 }
  0x1c   : > { %3062 = vmatpush3.bf16.msra.mxu0 %v3364_v2  ;;  %s3707_s27 = scalar_lea.vmem %s4217_s0, %s3299_s14  ;;  %v3384_v22 = vld [vmem:[%s4218_s1 + $0xb0] sm:$0xff]   ;;  %v3386_v26 = vld [vmem:[%s4218_s1 + $0xa8] sm:$0xff]   ;;  %v3388_v28 = vld [vmem:[%s4218_s1 + $0xa0] sm:$0xff]   ;;  %s2396_s14 = sshll.u32 %s4113_s11, 4  ;;  %s4141_s14 = int_to_ptr.vmem [resolvable:$true] %s2396_s14 }
  0x1d   : > { %3086 = vmatpush3.bf16.msra.mxu1 %v3365_v3  ;;  %3063 = vmatprep.subr.bf16.mxu0 %v3366_v4  ;;  %v3378_v12 = vld [vmem:[%s3707_s27 + $0x48] ss:$8 sps:$4 sm:$0xff]   ;;  %v3380_v18 = vld [vmem:[%s3707_s27 + $0x58] ss:$8 sps:$4 sm:$0xff]   ;;  %v611_v33 = vld [vmem:[%s3707_s27 + $0x4] sm:$0x1]  ;;  %s4133_s16 = scalar_lea.hbm %s4223_s6, %s2891_s13  ;;  %s4139_s18 = scalar_lea.hbm %s4222_s5, %s2891_s13 }
  0x1e   : > { %3087 = vmatprep.subr.bf16.mxu1 %v3367_v5  ;;  %v3379_v13 = vld [vmem:[%s3707_s27] ss:$8 sps:$4 sm:$0xff]   ;;  %3075 = vmatprep.mubr.bf16.mxu0 %v3378_v12  ;;  %v3381_v21 = vld [vmem:[%s3707_s27 + $0x10] ss:$8 sps:$4 sm:$0xff]   ;;  %v613_v35 = vld [vmem:[%s3707_s27 + $0xc] sm:$0x1] }
  0x1f   : > { %3099 = vmatprep.mubr.bf16.mxu1 %v3379_v13  ;;  %v3385_v23 = vld [vmem:[%s4218_s1 + $0xf0] sm:$0xff]   ;;  %v3393_v25 = vld [vmem:[%s3707_s27 + $0x20] ss:$8 sps:$4 sm:$0xff]   ;;  %v3390_v36 = vld [vmem:[%s4218_s1 + $0x98] sm:$0xff]   ;;  %v639_v39 = vshll.u32 %v611_v33, 16  ;;  %v653_v42 = vshll.u32 %v613_v35, 16 }
  0x20   : > { %3064 = vmatpush3.bf16.msra.mxu0 %v3366_v4  ;;  %v3392_v24 = vld [vmem:[%s3707_s27 + $0x68] ss:$8 sps:$4 sm:$0xff]   ;;  %v3394_v29 = vld [vmem:[%s3707_s27 + $0x78] ss:$8 sps:$4 sm:$0xff]   ;;  %v615_v51 = vld [vmem:[%s3707_s27 + $0x14] sm:$0x1] }
  0x21   : > { %3088 = vmatpush3.bf16.msra.mxu1 %v3367_v5  ;;  %3065 = vmatprep.subr.bf16.mxu0 %v3368_v6  ;;  %v3387_v27 = vld [vmem:[%s4218_s1 + $0xe8] sm:$0xff]   ;;  %v3389_v30 = vld [vmem:[%s4218_s1 + $0xe0] sm:$0xff]   ;;  %v3395_v31 = vld [vmem:[%s3707_s27 + $0x30] ss:$8 sps:$4 sm:$0xff]   ;;  %v641_v49 = vrot.slane %v639_v39, 5  ;;  %v667_v57 = vshll.u32 %v615_v51, 16 }
  0x22   : > { %3089 = vmatprep.subr.bf16.mxu1 %v3369_v7  ;;  %v610_v32 = vld [vmem:[%s3707_s27] sm:$0xf]  ;;  %v612_v34 = vld [vmem:[%s3707_s27 + $0x8] sm:$0xf]  ;;  %v3402_v43 = vld [vmem:[%s3707_s27 + $0x90] ss:$8 sps:$4 sm:$0xff]  }
  0x23   : > { %v630_v37 = vshrl.u32 %v610_v32, 16  ;;  %v633_v38 = vshll.u32 %v610_v32, 16  ;;  %v644_v40 = vshrl.u32 %v612_v34, 16  ;;  %v647_v41 = vshll.u32 %v612_v34, 16  ;;  %v3391_v44 = vld [vmem:[%s4218_s1 + $0xd8] sm:$0xff]   ;;  %v3396_v58 = vld [vmem:[%s4218_s1 + $0x90] sm:$0xff]   ;;  %vm3779_vm2 = vmor %vm626_vm0, %vm627_vm1 }
  0x24   : > { %3066 = vmatpush3.bf16.msra.mxu0 %v3368_v6  ;;  %v614_v48 = vld [vmem:[%s3707_s27 + $0x10] sm:$0xf]  ;;  %v616_v52 = vld [vmem:[%s3707_s27 + $0x18] sm:$0xf]  ;;  %v617_v54 = vld [vmem:[%s3707_s27 + $0x1c] sm:$0x1] }
  0x25   : > { %3090 = vmatpush3.bf16.msra.mxu1 %v3369_v7  ;;  %3067 = vmatprep.subr.bf16.mxu0 %v3370_v8  ;;  %v632_v45 = vrot.slane %v630_v37, 4  ;;  %v635_v46 = vrot.slane %v633_v38, 5  ;;  %v646_v47 = vrot.slane %v644_v40, 4  ;;  %v649_v50 = vrot.slane %v647_v41, 5  ;;  %v3397_v4 = vld [vmem:[%s4218_s1 + $0xd0] sm:$0xff]   ;;  %v3404_v51 = vld [vmem:[%s4218_s1 + $0x138] sm:$0xff]  }
  0x26   : > { %3091 = vmatprep.subr.bf16.mxu1 %v3371_v9  ;;  %v658_v55 = vshrl.u32 %v614_v48, 16  ;;  %v661_v56 = vshll.u32 %v614_v48, 16  ;;  %v655_v61 = vrot.slane %v653_v42, 5  ;;  %v672_v62 = vshrl.u32 %v616_v52, 16  ;;  %v624_v40 = vld [vmem:[%s3707_s27 + $0x38] sm:$0xf] }
  0x27   : > { %v636_v53 = vor.u32 %v635_v46, %v632_v45  ;;  %v650_v60 = vor.u32 %v649_v50, %v646_v47  ;;  %v675_v63 = vshll.u32 %v616_v52, 16  ;;  %v681_v3 = vshll.u32 %v617_v54, 16  ;;  %s3470_s28 = scalar_lea.vmem %s4126_s12, 512  ;;  %s3578_s8 = smov [#allocation4]  }
  0x28   : > { %3068 = vmatpush3.bf16.msra.mxu0 %v3370_v8  ;;  %v660_v1 = vrot.slane %v658_v55, 4  ;;  %v663_v2 = vrot.slane %v661_v56, 5  ;;  %v3786_v6 = vrot.slane %v667_v57, 5  ;;  %v674_v7 = vrot.slane %v672_v62, 4  ;;  %v3405_v55 = vld [vmem:[%s4218_s1 + $0x178] sm:$0xff]   ;;  %p3471_p12 = scmp.ne.s32.totalorder %s4126_s12, %s3470_s28  ;;  %s3474_s24 = sshll.u32 %s3578_s8, 4  ;;  %s3475_s24 = int_to_ptr.vmem [resolvable:$false] %s3474_s24 }
  0x29   : > { %3092 = vmatpush3.bf16.msra.mxu1 %v3371_v9  ;;  %3069 = vmatprep.subr.bf16.mxu0 %v3372_v10  ;;  %v637_v0 = vrot.slane %v636_v53, 4  ;;  %v651_v5 = vrot.slane %v650_v60, 4  ;;  %v677_v8 = vrot.slane %v675_v63, 5  ;;  %v3398_v9 = vld [vmem:[%s4218_s1 + $0x88] sm:$0xff]   ;;  %v731_v50 = vshll.u32 %v624_v40, 16  ;;  %s3476_s15 = scalar_lea.vmem %s3475_s24, 1024  ;;  %p3477_p1 = scmp.lt.s32.totalorder %s4126_s12, %s3475_s24 }
  0x2a   : > { %3093 = vmatprep.subr.bf16.mxu1 %v3373_v11  ;;  %p3472_p13 = pnand %p3471_p12, %p3657_p4  ;;  %p3478_p2 = scmp.lt.s32.totalorder %s3476_s15, %s3470_s28 }
  0x2b   : > { %v656_v12 = vsel %vm3779_vm2, %v651_v5, %v655_v61  ;;  %v678_v13 = vor.u32 %v677_v8, %v674_v7  ;;  %v3403_v61 = vld [vmem:[%s3707_s27 + $0xa0] ss:$8 sps:$4 sm:$0xff]   ;;  %v3407_v7 = vld [vmem:[%s4218_s1 + $0x170] sm:$0xff]  }
  0x2c   : > { %3070 = vmatpush3.bf16.msra.mxu0 %v3372_v10  ;;  %v642_v10 = vsel %vm3779_vm2, %v637_v0, %v641_v49  ;;  %v728_v49 = vshrl.u32 %v624_v40, 16  ;;  %v2706_v40 = vld [vmem:[%s3707_s27 + $0xa4] sm:$0x1]  ;;  %p3473_p0 = pneg %p3472_p13  ;;  %p3479_p3 = por %p3478_p2, %p3477_p1 }
  0x2d   : > { %3094 = vmatpush3.bf16.msra.mxu1 %v3373_v11  ;;  %3071 = vmatprep.subr.bf16.mxu0 %v3374_v14  ;;  %v664_v11 = vor.u32 %v663_v2, %v660_v1 }
  0x2e   : > { %3095 = vmatprep.subr.bf16.mxu1 %v3375_v15  ;;  %v730_v57 = vrot.slane %v728_v49, 4  ;;  %p3480_p5 = pnand %p3479_p3, %p3473_p0 }
  0x30   : > { %3072 = vmatpush3.bf16.msra.mxu0 %v3374_v14  ;;  %v2617_v14 = vcombine.low %v642_v10, %v656_v12  ;;  %v3408_v10 = vld [vmem:[%s4218_s1 + $0x128] sm:$0xff]  }
  0x31   : > { %3096 = vmatpush3.bf16.msra.mxu1 %v3375_v15  ;;  %3073 = vmatprep.subr.bf16.mxu0 %v3376_v16  ;;  %v665_v15 = vrot.slane %v664_v11, 4 }
  0x32   : > { %3097 = vmatprep.subr.bf16.mxu1 %v3377_v17 }
  0x34   : > { %3074 = vmatpush3.bf16.msra.mxu0 %v3376_v16  ;;  %v683_v16 = vrot.slane %v681_v3, 5 }
  0x35   : > { %3098 = vmatpush3.bf16.msra.mxu1 %v3377_v17  ;;  %3107 = vmatprep.subr.bf16.mxu0 %v3382_v19  ;;  %v3399_v17 = vld [vmem:[%s4218_s1 + $0xc8] sm:$0xff]  }
  0x36   : > { %3131 = vmatprep.subr.bf16.mxu1 %v3383_v20 }
  0x37   : > { %3076 = vmatmul.mubr.bf16.vlgmr.msra.gmra.mxu0 %v3380_v18  ;;  %v679_v18 = vrot.slane %v678_v13, 4  ;;  %v3409_v13 = vld [vmem:[%s4218_s1 + $0x168] sm:$0xff]  }
  0x38   : > { %3100 = vmatmul.mubr.bf16.vlgmr.msra.gmra.mxu1 %v3381_v21  ;;  %3108 = vmatpush3.bf16.msra.mxu0 %v3382_v19  ;;  %v618_v19 = vld [vmem:[%s3707_s27 + $0x20] sm:$0xf]  ;;  %v620_v21 = vld [vmem:[%s3707_s27 + $0x28] sm:$0xf] }
  0x39   : > { %3132 = vmatpush3.bf16.msra.mxu1 %v3383_v20  ;;  %3109 = vmatprep.subr.bf16.mxu0 %v3384_v22  ;;  %v619_v20 = vld [vmem:[%s3707_s27 + $0x24] sm:$0x1]  ;;  %v684_v32 = vsel %vm3779_vm2, %v679_v18, %v683_v16  ;;  %v3414_v18 = vld [vmem:[%s4218_s1 + $0x118] sm:$0xff]  }
  0x3a   : > { %3133 = vmatprep.subr.bf16.mxu1 %v3385_v23  ;;  %3079 = vmatprep.mubr.bf16.mxu0 %v3392_v24  ;;  %v689_v24 = vshll.u32 %v618_v19, 16  ;;  %v3412_v16 = vld [vmem:[%s4218_s1 + $0x120] sm:$0xff]  }
  0x3b   : > { %3103 = vmatprep.mubr.bf16.mxu1 %v3393_v25  ;;  %v3400_v25 = vld [vmem:[%s4218_s1 + $0x80] sm:$0xff]  }
  0x3c   : > { %3110 = vmatpush3.bf16.msra.mxu0 %v3384_v22  ;;  %v621_v22 = vld [vmem:[%s3707_s27 + $0x2c] sm:$0x1]  ;;  %v691_v34 = vrot.slane %v689_v24, 5 }
  0x3d   : > { %3134 = vmatpush3.bf16.msra.mxu1 %v3385_v23  ;;  %3111 = vmatprep.subr.bf16.mxu0 %v3386_v26  ;;  %v686_v23 = vshrl.u32 %v618_v19, 16  ;;  %v709_v35 = vshll.u32 %v621_v22, 16  ;;  %v3422_v19 = vld [vmem:[%s3707_s27 + $0xd8] ss:$8 sps:$4 sm:$0xff]  }
  0x3e   : > { %3135 = vmatprep.subr.bf16.mxu1 %v3387_v27  ;;  %v2703_v22 = vld [vmem:[%s3707_s27 + $0x98] sm:$0xf] }
  0x3f   : > { %3080 = vmatmul.mubr.bf16.gmra.mxu0 %v3394_v29  ;;  %v703_v29 = vshll.u32 %v620_v21, 16  ;;  %v688_v33 = vrot.slane %v686_v23, 4  ;;  %v2704_v23 = vld [vmem:[%s3707_s27 + $0x9c] sm:$0x1] }
  0x40   : > { %3112 = vmatpush3.bf16.msra.mxu0 %v3386_v26  ;;  %3104 = vmatmul.mubr.bf16.gmra.mxu1 %v3395_v31  ;;  %v670_v26 = vsel %vm3779_vm2, %v665_v15, %v3786_v6  ;;  %v3401_v31 = vld [vmem:[%s4218_s1 + $0xc0] sm:$0xff]   ;;  %v3410_v6 = vld [vmem:[%s3707_s27 + $0xb0] ss:$8 sps:$4 sm:$0xff]  }
  0x41   : > { %3136 = vmatpush3.bf16.msra.mxu1 %v3387_v27  ;;  %3113 = vmatprep.subr.bf16.mxu0 %v3388_v28  ;;  %v695_v27 = vshll.u32 %v619_v20, 16  ;;  %v705_v39 = vrot.slane %v703_v29, 5  ;;  %v692_v42 = vor.u32 %v691_v34, %v688_v33  ;;  %v2618_v60 = vcombine.low %v670_v26, %v684_v32  ;;  %v3411_v15 = vld [vmem:[%s3707_s27 + $0xc0] ss:$8 sps:$4 sm:$0xff]   ;;  %v2701_v20 = vld [vmem:[%s3707_s27 + $0x90] sm:$0xf] }
  0x42   : > { %3137 = vmatprep.subr.bf16.mxu1 %v3389_v30  ;;  %3147 = vmatprep.mubr.bf16.mxu1 %v3402_v43  ;;  %v711_v43 = vrot.slane %v709_v35, 5  ;;  %v1258_v24 = vshrl.u32 %v2701_v20, 16  ;;  %v1281_v29 = vshll.u32 %v2704_v23, 16  ;;  %v3416_v33 = vld [vmem:[%s4218_s1 + $0x110] sm:$0xff]   ;;  %v2713_v23 = vld [vmem:[%s3707_s27 + $0xc0] sm:$0xf] }
  0x43   : > { %3123 = vmatprep.mubr.bf16.mxu0 %v2617_v14  ;;  %v697_v37 = vrot.slane %v695_v27, 5  ;;  %v693_v52 = vrot.slane %v692_v42, 4  ;;  %v1272_v27 = vshrl.u32 %v2703_v22, 16  ;;  %v2708_v42 = vld [vmem:[%s3707_s27 + $0xac] sm:$0x1] }
  0x44   : > { %3114 = vmatpush3.bf16.msra.mxu0 %v3388_v28  ;;  %v700_v28 = vshrl.u32 %v620_v21, 16  ;;  %v2702_v21 = vld [vmem:[%s3707_s27 + $0x94] sm:$0x1] }
  0x45   : > { %3138 = vmatpush3.bf16.msra.mxu1 %v3389_v30  ;;  %3115 = vmatprep.subr.bf16.mxu0 %v3390_v36  ;;  %v622_v30 = vld [vmem:[%s3707_s27 + $0x30] sm:$0xf]  ;;  %v698_v62 = vsel %vm3779_vm2, %v693_v52, %v697_v37  ;;  %v1267_v26 = vshll.u32 %v2702_v21, 16  ;;  %v1274_v35 = vrot.slane %v1272_v27, 4  ;;  %v1283_v37 = vrot.slane %v1281_v29, 5 }
  0x46   : > { %3139 = vmatprep.subr.bf16.mxu1 %v3391_v44  ;;  %v702_v38 = vrot.slane %v700_v28, 4  ;;  %v714_v41 = vshrl.u32 %v622_v30, 16  ;;  %v717_v45 = vshll.u32 %v622_v30, 16  ;;  %v1275_v28 = vshll.u32 %v2703_v22, 16  ;;  %v3415_v30 = vld [vmem:[%s4218_s1 + $0x158] sm:$0xff]  }
  0x47   : > { %v1269_v34 = vrot.slane %v1267_v26, 5  ;;  %v2715_v29 = vld [vmem:[%s3707_s27 + $0xc8] sm:$0xf] }
  0x48   : > { %3116 = vmatpush3.bf16.msra.mxu0 %v3390_v36  ;;  %v623_v36 = vld [vmem:[%s3707_s27 + $0x34] sm:$0x1]  ;;  %v706_v47 = vor.u32 %v705_v39, %v702_v38  ;;  %v716_v48 = vrot.slane %v714_v41, 4  ;;  %v719_v53 = vrot.slane %v717_v45, 5  ;;  %v2705_v38 = vld [vmem:[%s3707_s27 + $0xa0] sm:$0xf] }
  0x49   : > { %3140 = vmatpush3.bf16.msra.mxu1 %v3391_v44  ;;  %3117 = vmatprep.subr.bf16.mxu0 %v3396_v58  ;;  %v625_v44 = vld [vmem:[%s3707_s27 + $0x3c] sm:$0x1]  ;;  %v723_v46 = vshll.u32 %v623_v36, 16  ;;  %v1277_v36 = vrot.slane %v1275_v28, 5  ;;  %v2707_v41 = vld [vmem:[%s3707_s27 + $0xa8] sm:$0xf] }
  0x4a   : > { %3141 = vmatprep.subr.bf16.mxu1 %v3397_v4  ;;  %v737_v54 = vshll.u32 %v625_v44, 16  ;;  %v707_v56 = vrot.slane %v706_v47, 4  ;;  %v720_v63 = vor.u32 %v719_v53, %v716_v48  ;;  %v1286_v45 = vshrl.u32 %v2705_v38, 16 }
  0x4b   : > { %v725_v1 = vrot.slane %v723_v46, 5  ;;  %v1278_v44 = vor.u32 %v1277_v36, %v1274_v35  ;;  %v1289_v46 = vshll.u32 %v2705_v38, 16  ;;  %v1295_v47 = vshll.u32 %v2706_v40, 16  ;;  %v3428_v35 = vld [vmem:[%s3707_s27 + $0xf8] ss:$8 sps:$4 sm:$0xff]   ;;  %v3426_v40 = vld [vmem:[%s4218_s1 + $0x1b0] sm:$0xff]  }
  0x4c   : > { %3118 = vmatpush3.bf16.msra.mxu0 %v3396_v58  ;;  %v733_v58 = vrot.slane %v731_v50, 5  ;;  %v712_v0 = vsel %vm3779_vm2, %v707_v56, %v711_v43  ;;  %v739_v3 = vrot.slane %v737_v54, 5  ;;  %v721_v5 = vrot.slane %v720_v63, 4  ;;  %v3417_v43 = vld [vmem:[%s4218_s1 + $0x150] sm:$0xff]  }
  0x4d   : > { %3142 = vmatpush3.bf16.msra.mxu1 %v3397_v4  ;;  %3119 = vmatprep.subr.bf16.mxu0 %v3398_v9  ;;  %v3406_v4 = vld [vmem:[%s4218_s1 + $0x130] sm:$0xff]   ;;  %v2619_v8 = vcombine.low %v698_v62, %v712_v0  ;;  %v1300_v49 = vshrl.u32 %v2707_v41, 16  ;;  %v1303_v50 = vshll.u32 %v2707_v41, 16  ;;  %v1279_v52 = vrot.slane %v1278_v44, 4 }
  0x4e   : > { %3143 = vmatprep.subr.bf16.mxu1 %v3399_v17  ;;  %v734_v2 = vor.u32 %v733_v58, %v730_v57  ;;  %v726_v11 = vsel %vm3779_vm2, %v721_v5, %v725_v1  ;;  %v1288_v53 = vrot.slane %v1286_v45, 4  ;;  %v1291_v54 = vrot.slane %v1289_v46, 5  ;;  %v3427_v45 = vld [vmem:[%s4218_s1 + $0x1f0] sm:$0xff]  }
  0x4f   : > { %v1302_v57 = vrot.slane %v1300_v49, 4  ;;  %v1305_v58 = vrot.slane %v1303_v50, 5  ;;  %v1297_v0 = vrot.slane %v1295_v47, 5  ;;  %v1356_v38 = vshrl.u32 %v2715_v29, 16 }
  0x50   : > { %3120 = vmatpush3.bf16.msra.mxu0 %v3398_v9  ;;  %v735_v9 = vrot.slane %v734_v2, 4  ;;  %v1292_v62 = vor.u32 %v1291_v54, %v1288_v53 }
  0x51   : > { %3144 = vmatpush3.bf16.msra.mxu1 %v3399_v17  ;;  %3121 = vmatprep.subr.bf16.mxu0 %v3400_v25  ;;  %v3413_v17 = vld [vmem:[%s4218_s1 + $0x160] sm:$0xff]   ;;  %v1306_v1 = vor.u32 %v1305_v58, %v1302_v57  ;;  %v1358_v47 = vrot.slane %v1356_v38, 4  ;;  %v3431_v58 = vld [vmem:[%s4218_s1 + $0x1e8] sm:$0xff]   ;;  %v2821_v38 = vld [vmem:[%s3707_s27 + $0x18] sm:$0xf] }
  0x52   : > { %3145 = vmatprep.subr.bf16.mxu1 %v3401_v31  ;;  %v740_v12 = vsel %vm3779_vm2, %v735_v9, %v739_v3  ;;  %v1293_v3 = vrot.slane %v1292_v62, 4  ;;  %v3424_v9 = vld [vmem:[%s4218_s1 + $0x1b8] sm:$0xff]   ;;  %v3429_v62 = vld [vmem:[%s3707_s27 + $0x108] ss:$8 sps:$4 sm:$0xff]  }
  0x53   : > { %v2620_v14 = vcombine.low %v726_v11, %v740_v12  ;;  %v1307_v5 = vrot.slane %v1306_v1, 4  ;;  %v2710_v11 = vld [vmem:[%s3707_s27 + $0xb4] sm:$0x1]  ;;  %v2711_v12 = vld [vmem:[%s3707_s27 + $0xb8] sm:$0xf] }
  0x54   : > { %3122 = vmatpush3.bf16.msra.mxu0 %v3400_v25  ;;  %v1261_v25 = vshll.u32 %v2701_v20, 16  ;;  %v1331_v21 = vshll.u32 %v2711_v12, 16 }
  0x55   : > { %3146 = vmatpush3.bf16.msra.mxu1 %v3401_v31  ;;  %3155 = vmatprep.subr.bf16.mxu0 %v3404_v51  ;;  %v1260_v31 = vrot.slane %v1258_v24, 4  ;;  %v2714_v24 = vld [vmem:[%s3707_s27 + $0xc4] sm:$0x1] }
  0x56   : > { %3179 = vmatprep.subr.bf16.mxu1 %v3405_v55  ;;  %v1263_v32 = vrot.slane %v1261_v25, 5 }
  0x57   : > { %3124 = vmatmul.mubr.bf16.vlgmr.msra.gmra.mxu0 %v2618_v60  ;;  %v3419_v60 = vld [vmem:[%s4218_s1 + $0x148] sm:$0xff]  }
  0x58   : > { %3148 = vmatmul.mubr.bf16.vlgmr.msra.gmra.mxu1 %v3403_v61  ;;  %3156 = vmatpush3.bf16.msra.mxu0 %v3404_v51  ;;  %v1264_v39 = vor.u32 %v1263_v32, %v1260_v31  ;;  %v1309_v51 = vshll.u32 %v2708_v42, 16  ;;  %v1284_v61 = vsel %vm3779_vm2, %v1279_v52, %v1283_v37  ;;  %v2716_v32 = vld [vmem:[%s3707_s27 + $0xcc] sm:$0x1]  ;;  %v1351_v37 = vshll.u32 %v2714_v24, 16 }
  0x59   : > { %3180 = vmatpush3.bf16.msra.mxu1 %v3405_v55  ;;  %3157 = vmatprep.subr.bf16.mxu0 %v3406_v4  ;;  %v3418_v55 = vld [vmem:[%s4218_s1 + $0x108] sm:$0xff]   ;;  %v1365_v44 = vshll.u32 %v2716_v32, 16 }
  0x5a   : > { %3181 = vmatprep.subr.bf16.mxu1 %v3407_v7  ;;  %3127 = vmatprep.mubr.bf16.mxu0 %v2619_v8  ;;  %v1265_v48 = vrot.slane %v1264_v39, 4  ;;  %v1311_v2 = vrot.slane %v1309_v51, 5  ;;  %v1359_v39 = vshll.u32 %v2715_v29, 16  ;;  %v1353_v51 = vrot.slane %v1351_v37, 5  ;;  %v2818_v24 = vld [vmem:[%s3707_s27 + $0xc] sm:$0x1] }
  0x5b   : > { %3151 = vmatprep.mubr.bf16.mxu1 %v3410_v6  ;;  %v3421_v6 = vld [vmem:[%s4218_s1 + $0x140] sm:$0xff]   ;;  %v1367_v54 = vrot.slane %v1365_v44, 5  ;;  %v3453_v32 = vld [vmem:[%s4220_s3 + $0x28] sm:$0xff]  }
  0x5c   : > { %3158 = vmatpush3.bf16.msra.mxu0 %v3406_v4  ;;  %v1270_v56 = vsel %vm3779_vm2, %v1265_v48, %v1269_v34  ;;  %v3420_v4 = vld [vmem:[%s4218_s1 + $0x100] sm:$0xff]   ;;  %v1312_v8 = vsel %vm3779_vm2, %v1307_v5, %v1311_v2  ;;  %v1345_v34 = vshll.u32 %v2713_v23, 16  ;;  %v1361_v48 = vrot.slane %v1359_v39, 5  ;;  %v3442_v5 = vld [vmem:[%s3707_s27 + $0x8] ss:$8 sps:$4 sm:$0xff]  }
  0x5d   : > { %3182 = vmatpush3.bf16.msra.mxu1 %v3407_v7  ;;  %3159 = vmatprep.subr.bf16.mxu0 %v3408_v10  ;;  %v2733_v63 = vcombine.low %v1270_v56, %v1284_v61  ;;  %v1298_v7 = vsel %vm3779_vm2, %v1293_v3, %v1297_v0  ;;  %v3432_v2 = vld [vmem:[%s4218_s1 + $0x1a0] sm:$0xff]  }
  0x5e   : > { %3183 = vmatprep.subr.bf16.mxu1 %v3409_v13  ;;  %v2734_v20 = vcombine.low %v1298_v7, %v1312_v8  ;;  %v1362_v53 = vor.u32 %v1361_v48, %v1358_v47  ;;  %v3433_v3 = vld [vmem:[%s4218_s1 + $0x1e0] sm:$0xff]   ;;  %v3435_v7 = vld [vmem:[%s4218_s1 + $0x1d8] sm:$0xff]   ;;  %v3436_v8 = vld [vmem:[%s4218_s1 + $0x190] sm:$0xff]  }
  0x5f   : > { %3128 = vmatmul.mubr.bf16.gmra.mxu0 %v2620_v14  ;;  %v2712_v14 = vld [vmem:[%s3707_s27 + $0xbc] sm:$0x1]  ;;  %v3455_v39 = vld [vmem:[%s3707_s27 + $0x80] ss:$8 sps:$4 sm:$0xff]  }
  0x60   : > { %3160 = vmatpush3.bf16.msra.mxu0 %v3408_v10  ;;  %3152 = vmatmul.mubr.bf16.gmra.mxu1 %v3411_v15  ;;  %v2709_v10 = vld [vmem:[%s3707_s27 + $0xb0] sm:$0xf]  ;;  %v1337_v22 = vshll.u32 %v2712_v14, 16  ;;  %v1363_v61 = vrot.slane %v1362_v53, 4  ;;  %v3444_v14 = vld [vmem:[%s3707_s27 + $0x18] ss:$8 sps:$4 sm:$0xff]  }
  0x61   : > { %3184 = vmatpush3.bf16.msra.mxu1 %v3409_v13  ;;  %3161 = vmatprep.subr.bf16.mxu0 %v3412_v16  ;;  %v3425_v13 = vld [vmem:[%s4218_s1 + $0x1f8] sm:$0xff]   ;;  %v1314_v15 = vshrl.u32 %v2709_v10, 16 }
  0x62   : > { %3185 = vmatprep.subr.bf16.mxu1 %v3413_v17  ;;  %3171 = vmatprep.mubr.bf16.mxu0 %v3422_v19  ;;  %v3423_v19 = vld [vmem:[%s3707_s27 + $0xe8] ss:$8 sps:$4 sm:$0xff]   ;;  %v1339_v31 = vrot.slane %v1337_v22, 5  ;;  %v1368_v0 = vsel %vm3779_vm2, %v1363_v61, %v1367_v54  ;;  %v3459_v61 = vld [vmem:[%s4220_s3 + $0x18] sm:$0xff]  }
  0x63   : > { %3195 = vmatprep.mubr.bf16.mxu1 %v2733_v63  ;;  %v1316_v25 = vrot.slane %v1314_v15, 4  ;;  %v3446_v15 = vld [vmem:[%s4218_s1 + $0x238] sm:$0xff]  }
  0x64   : > { %3162 = vmatpush3.bf16.msra.mxu0 %v3412_v16  ;;  %v1317_v16 = vshll.u32 %v2709_v10, 16  ;;  %v3438_v10 = vld [vmem:[%s4218_s1 + $0x188] sm:$0xff]   ;;  %v3454_v22 = vld [vmem:[%s3707_s27 + $0x70] ss:$8 sps:$4 sm:$0xff]  }
  0x65   : > { %3186 = vmatpush3.bf16.msra.mxu1 %v3413_v17  ;;  %3163 = vmatprep.subr.bf16.mxu0 %v3414_v18  ;;  %v1323_v17 = vshll.u32 %v2710_v11, 16  ;;  %v3439_v11 = vld [vmem:[%s4218_s1 + $0x1c8] sm:$0xff]  }
  0x66   : > { %3187 = vmatprep.subr.bf16.mxu1 %v3415_v30  ;;  %v1319_v26 = vrot.slane %v1317_v16, 5  ;;  %v3447_v16 = vld [vmem:[%s4220_s3 + $0x38] sm:$0xff]  }
  0x67   : > { %v1325_v27 = vrot.slane %v1323_v17, 5  ;;  %v3445_v17 = vld [vmem:[%s3707_s27 + $0x60] ss:$8 sps:$4 sm:$0xff]  }
  0x68   : > { %3164 = vmatpush3.bf16.msra.mxu0 %v3414_v18  ;;  %v1328_v18 = vshrl.u32 %v2711_v12, 16  ;;  %v1320_v36 = vor.u32 %v1319_v26, %v1316_v25  ;;  %v3440_v12 = vld [vmem:[%s4218_s1 + $0x180] sm:$0xff]   ;;  %v2819_v25 = vld [vmem:[%s3707_s27 + $0x10] sm:$0xf]  ;;  %v2820_v26 = vld [vmem:[%s3707_s27 + $0x14] sm:$0x1] }
  0x69   : > { %3188 = vmatpush3.bf16.msra.mxu1 %v3415_v30  ;;  %3165 = vmatprep.subr.bf16.mxu0 %v3416_v33  ;;  %v1333_v30 = vrot.slane %v1331_v21, 5  ;;  %v3452_v21 = vld [vmem:[%s4218_s1 + $0x228] sm:$0xff]  }
  0x6a   : > { %3189 = vmatprep.subr.bf16.mxu1 %v3417_v43  ;;  %v1330_v28 = vrot.slane %v1328_v18, 4  ;;  %v1321_v46 = vrot.slane %v1320_v36, 4  ;;  %v3448_v18 = vld [vmem:[%s4218_s1 + $0x230] sm:$0xff]  }
  0x6c   : > { %3166 = vmatpush3.bf16.msra.mxu0 %v3416_v33  ;;  %v1342_v33 = vshrl.u32 %v2713_v23, 16  ;;  %v1334_v41 = vor.u32 %v1333_v30, %v1330_v28  ;;  %v1326_v52 = vsel %vm3779_vm2, %v1321_v46, %v1325_v27  ;;  %v2817_v23 = vld [vmem:[%s3707_s27 + $0x8] sm:$0xf]  ;;  %v3451_v27 = vld [vmem:[%s3707_s27 + $0x38] ss:$8 sps:$4 sm:$0xff]   ;;  %v1896_v30 = vshll.u32 %v2818_v24, 16 }
  0x6d   : > { %3190 = vmatpush3.bf16.msra.mxu1 %v3417_v43  ;;  %3167 = vmatprep.subr.bf16.mxu0 %v3418_v55  ;;  %v1347_v43 = vrot.slane %v1345_v34, 5  ;;  %v1887_v28 = vshrl.u32 %v2817_v23, 16  ;;  %v1890_v29 = vshll.u32 %v2817_v23, 16  ;;  %v1910_v34 = vshll.u32 %v2820_v26, 16 }
  0x6e   : > { %3191 = vmatprep.subr.bf16.mxu1 %v3419_v60  ;;  %v1344_v42 = vrot.slane %v1342_v33, 4  ;;  %v1335_v49 = vrot.slane %v1334_v41, 4  ;;  %v1904_v33 = vshll.u32 %v2819_v25, 16  ;;  %v2823_v41 = vld [vmem:[%s3707_s27 + $0x20] sm:$0xf]  ;;  %v1915_v46 = vshrl.u32 %v2821_v38, 16 }
  0x6f   : > { %v1892_v36 = vrot.slane %v1890_v29, 5  ;;  %v1912_v48 = vrot.slane %v1910_v34, 5  ;;  %v1932_v53 = vshll.u32 %v2823_v41, 16 }
  0x70   : > { %3168 = vmatpush3.bf16.msra.mxu0 %v3418_v55  ;;  %v1348_v50 = vor.u32 %v1347_v43, %v1344_v42  ;;  %v3430_v55 = vld [vmem:[%s4218_s1 + $0x1a8] sm:$0xff]   ;;  %v1340_v56 = vsel %vm3779_vm2, %v1335_v49, %v1339_v31  ;;  %v1901_v31 = vshrl.u32 %v2819_v25, 16  ;;  %v3456_v42 = vld [vmem:[%s4218_s1 + $0x220] sm:$0xff]  }
  0x71   : > { %3192 = vmatpush3.bf16.msra.mxu1 %v3419_v60  ;;  %3169 = vmatprep.subr.bf16.mxu0 %v3420_v4  ;;  %v2735_v60 = vcombine.low %v1326_v52, %v1340_v56  ;;  %v3457_v43 = vld [vmem:[%s4220_s3 + $0x20] sm:$0xff]   ;;  %v1929_v52 = vshrl.u32 %v2823_v41, 16 }
  0x72   : > { %3193 = vmatprep.subr.bf16.mxu1 %v3421_v6  ;;  %v1349_v57 = vrot.slane %v1348_v50, 4  ;;  %v1903_v37 = vrot.slane %v1901_v31, 4  ;;  %v3466_v49 = vld [vmem:[%s3707_s27 + $0xd8] ss:$8 sps:$4 sm:$0xff]   ;;  %v1918_v50 = vshll.u32 %v2821_v38, 16 }
  0x73   : > { %v2830_v38 = vld [vmem:[%s3707_s27 + $0x3c] sm:$0x1] }
  0x74   : > { %3170 = vmatpush3.bf16.msra.mxu0 %v3420_v4  ;;  %v1354_v63 = vsel %vm3779_vm2, %v1349_v57, %v1353_v51  ;;  %v3434_v4 = vld [vmem:[%s4218_s1 + $0x198] sm:$0xff]   ;;  %v1917_v57 = vrot.slane %v1915_v46, 4 }
  0x75   : > { %3194 = vmatpush3.bf16.msra.mxu1 %v3421_v6  ;;  %3203 = vmatprep.subr.bf16.mxu0 %v3424_v9  ;;  %v2736_v1 = vcombine.low %v1354_v63, %v1368_v0  ;;  %v3443_v6 = vld [vmem:[%s3707_s27 + $0x50] ss:$8 sps:$4 sm:$0xff]   ;;  %v2822_v63 = vld [vmem:[%s3707_s27 + $0x1c] sm:$0x1]  ;;  %v1920_v0 = vrot.slane %v1918_v50, 5  ;;  %v1980_v50 = vshll.u32 %v2830_v38, 16 }
  0x76   : > { %3227 = vmatprep.subr.bf16.mxu1 %v3425_v13 }
  0x77   : > { %3172 = vmatmul.mubr.bf16.vlgmr.msra.gmra.mxu0 %v3423_v19  ;;  %v3449_v19 = vld [vmem:[%s4220_s3 + $0x30] sm:$0xff]  }
  0x78   : > { %3196 = vmatmul.mubr.bf16.vlgmr.msra.gmra.mxu1 %v2734_v20  ;;  %3204 = vmatpush3.bf16.msra.mxu0 %v3424_v9  ;;  %v3437_v9 = vld [vmem:[%s4218_s1 + $0x1d0] sm:$0xff]  }
  0x79   : > { %3228 = vmatpush3.bf16.msra.mxu1 %v3425_v13  ;;  %3205 = vmatprep.subr.bf16.mxu0 %v3426_v40  ;;  %v3441_v13 = vld [vmem:[%s4218_s1 + $0x1c0] sm:$0xff]   ;;  %v3450_v20 = vld [vmem:[%s3707_s27 + $0x28] ss:$8 sps:$4 sm:$0xff]  }
  0x7a   : > { %3229 = vmatprep.subr.bf16.mxu1 %v3427_v45  ;;  %3175 = vmatprep.mubr.bf16.mxu0 %v3428_v35  ;;  %v1889_v35 = vrot.slane %v1887_v28, 4 }
  0x7b   : > { %3199 = vmatprep.mubr.bf16.mxu1 %v2735_v60  ;;  %v2827_v60 = vld [vmem:[%s3707_s27 + $0x30] sm:$0xf] }
  0x7c   : > { %3206 = vmatpush3.bf16.msra.mxu0 %v3426_v40  ;;  %v1906_v40 = vrot.slane %v1904_v33, 5  ;;  %v1893_v44 = vor.u32 %v1892_v36, %v1889_v35  ;;  %v3464_v33 = vld [vmem:[%s4218_s1 + $0x200] sm:$0xff]  }
  0x7d   : > { %3230 = vmatpush3.bf16.msra.mxu1 %v3427_v45  ;;  %3207 = vmatprep.subr.bf16.mxu0 %v3430_v55  ;;  %v1898_v45 = vrot.slane %v1896_v30, 5 }
  0x7e   : > { %3231 = vmatprep.subr.bf16.mxu1 %v3431_v58  ;;  %v1907_v47 = vor.u32 %v1906_v40, %v1903_v37  ;;  %v1894_v51 = vrot.slane %v1893_v44, 4 }
  0x7f   : > { %3176 = vmatmul.mubr.bf16.gmra.mxu0 %v3429_v62 }
  0x80   : > { %3208 = vmatpush3.bf16.msra.mxu0 %v3430_v55  ;;  %3200 = vmatmul.mubr.bf16.gmra.mxu1 %v2736_v1  ;;  %v1908_v54 = vrot.slane %v1907_v47, 4  ;;  %v3458_v55 = vld [vmem:[%s4218_s1 + $0x218] sm:$0xff]   ;;  %v1899_v56 = vsel %vm3779_vm2, %v1894_v51, %v1898_v45  ;;  %v2832_v47 = vld [vmem:[%s3707_s27 + $0x44] sm:$0x1] }
  0x81   : > { %3232 = vmatpush3.bf16.msra.mxu1 %v3431_v58  ;;  %3209 = vmatprep.subr.bf16.mxu0 %v3432_v2  ;;  %v2825_v58 = vld [vmem:[%s3707_s27 + $0x28] sm:$0xf] }
  0x82   : > { %3233 = vmatprep.subr.bf16.mxu1 %v3433_v3  ;;  %3219 = vmatprep.mubr.bf16.mxu0 %v3442_v5  ;;  %v1913_v62 = vsel %vm3779_vm2, %v1908_v54, %v1912_v48  ;;  %v1943_v1 = vshrl.u32 %v2825_v58, 16  ;;  %v1934_v5 = vrot.slane %v1932_v53, 5  ;;  %v3465_v48 = vld [vmem:[%s4220_s3] sm:$0xff]   ;;  %v1994_v54 = vshll.u32 %v2832_v47, 16 }
  0x83   : > { %3243 = vmatprep.mubr.bf16.mxu1 %v3443_v6  ;;  %v1957_v6 = vshrl.u32 %v2827_v60, 16 }
  0x84   : > { %3210 = vmatpush3.bf16.msra.mxu0 %v3432_v2  ;;  %v1946_v2 = vshll.u32 %v2825_v58, 16  ;;  %v1982_v58 = vrot.slane %v1980_v50, 5 }
  0x85   : > { %3234 = vmatpush3.bf16.msra.mxu1 %v3433_v3  ;;  %3211 = vmatprep.subr.bf16.mxu0 %v3434_v4  ;;  %v2849_v3 = vcombine.low %v1899_v56, %v1913_v62 }
  0x86   : > { %3235 = vmatprep.subr.bf16.mxu1 %v3435_v7 }
  0x88   : > { %3212 = vmatpush3.bf16.msra.mxu0 %v3434_v4  ;;  %v1931_v4 = vrot.slane %v1929_v52, 4 }
  0x89   : > { %3236 = vmatpush3.bf16.msra.mxu1 %v3435_v7  ;;  %3213 = vmatprep.subr.bf16.mxu0 %v3436_v8  ;;  %v2824_v7 = vld [vmem:[%s3707_s27 + $0x24] sm:$0x1] }
  0x8a   : > { %3237 = vmatprep.subr.bf16.mxu1 %v3437_v9 }
  0x8c   : > { %3214 = vmatpush3.bf16.msra.mxu0 %v3436_v8  ;;  %v2826_v8 = vld [vmem:[%s3707_s27 + $0x2c] sm:$0x1] }
  0x8d   : > { %3238 = vmatpush3.bf16.msra.mxu1 %v3437_v9  ;;  %3215 = vmatprep.subr.bf16.mxu0 %v3438_v10  ;;  %v1960_v9 = vshll.u32 %v2827_v60, 16  ;;  %v1952_v23 = vshll.u32 %v2826_v8, 16  ;;  %v3467_v60 = vld [vmem:[%s3707_s27 + $0xe8] ss:$8 sps:$4 sm:$0xff]  }
  0x8e   : > { %3239 = vmatprep.subr.bf16.mxu1 %v3439_v11 }
  0x8f   : > { %v1954_v44 = vrot.slane %v1952_v23, 5 }
  0x90   : > { %3216 = vmatpush3.bf16.msra.mxu0 %v3438_v10  ;;  %v3460_v10 = vld [vmem:[%s4218_s1 + $0x210] sm:$0xff]  }
  0x91   : > { %3240 = vmatpush3.bf16.msra.mxu1 %v3439_v11  ;;  %3217 = vmatprep.subr.bf16.mxu0 %v3440_v12  ;;  %v1945_v11 = vrot.slane %v1943_v1, 4  ;;  %v3468_v1 = vld [vmem:[%s3707_s27 + $0xf8] ss:$8 sps:$4 sm:$0xff]  }
  0x92   : > { %3241 = vmatprep.subr.bf16.mxu1 %v3441_v13 }
  0x94   : > { %3218 = vmatpush3.bf16.msra.mxu0 %v3440_v12  ;;  %v1948_v12 = vrot.slane %v1946_v2, 5 }
  0x95   : > { %3242 = vmatpush3.bf16.msra.mxu1 %v3441_v13  ;;  %3251 = vmatprep.subr.bf16.mxu0 %v3446_v15  ;;  %v1959_v13 = vrot.slane %v1957_v6, 4 }
  0x96   : > { %3275 = vmatprep.subr.bf16.mxu1 %v3447_v16  ;;  %v1949_v28 = vor.u32 %v1948_v12, %v1945_v11 }
  0x97   : > { %3220 = vmatmul.mubr.bf16.vlgmr.msra.gmra.mxu0 %v3444_v14  ;;  %v2829_v14 = vld [vmem:[%s3707_s27 + $0x38] sm:$0xf] }
  0x98   : > { %3244 = vmatmul.mubr.bf16.vlgmr.msra.gmra.mxu1 %v3445_v17  ;;  %3252 = vmatpush3.bf16.msra.mxu0 %v3446_v15  ;;  %v3461_v15 = vld [vmem:[%s4220_s3 + $0x10] sm:$0xff]   ;;  %v1962_v17 = vrot.slane %v1960_v9, 5  ;;  %v1971_v24 = vshrl.u32 %v2829_v14, 16  ;;  %v1974_v25 = vshll.u32 %v2829_v14, 16 }
  0x99   : > { %3276 = vmatpush3.bf16.msra.mxu1 %v3447_v16  ;;  %3253 = vmatprep.subr.bf16.mxu0 %v3448_v18  ;;  %v2828_v16 = vld [vmem:[%s3707_s27 + $0x34] sm:$0x1] }
  0x9a   : > { %3277 = vmatprep.subr.bf16.mxu1 %v3449_v19  ;;  %3223 = vmatprep.mubr.bf16.mxu0 %v3450_v20  ;;  %v1924_v20 = vshll.u32 %v2822_v63, 16  ;;  %v1963_v29 = vor.u32 %v1962_v17, %v1959_v13  ;;  %v1966_v30 = vshll.u32 %v2828_v16, 16  ;;  %v1976_v40 = vrot.slane %v1974_v25, 5 }
  0x9b   : > { %3247 = vmatprep.mubr.bf16.mxu1 %v3454_v22  ;;  %v1938_v22 = vshll.u32 %v2824_v7, 16 }
  0x9c   : > { %3254 = vmatpush3.bf16.msra.mxu0 %v3448_v18  ;;  %v2831_v18 = vld [vmem:[%s3707_s27 + $0x40] sm:$0xf]  ;;  %v1926_v35 = vrot.slane %v1924_v20, 5  ;;  %v1964_v45 = vrot.slane %v1963_v29, 4  ;;  %v1968_v46 = vrot.slane %v1966_v30, 5 }
  0x9d   : > { %3278 = vmatpush3.bf16.msra.mxu1 %v3449_v19  ;;  %3255 = vmatprep.subr.bf16.mxu0 %v3452_v21  ;;  %v1921_v19 = vor.u32 %v1920_v0, %v1917_v57  ;;  %v1985_v26 = vshrl.u32 %v2831_v18, 16  ;;  %v1988_v31 = vshll.u32 %v2831_v18, 16  ;;  %v1940_v37 = vrot.slane %v1938_v22, 5 }
  0x9e   : > { %3279 = vmatprep.subr.bf16.mxu1 %v3453_v32  ;;  %v1969_v56 = vsel %vm3779_vm2, %v1964_v45, %v1968_v46  ;;  %v1996_v0 = vrot.slane %v1994_v54, 5 }
  0x9f   : > { %3224 = vmatmul.mubr.bf16.gmra.mxu0 %v3451_v27  ;;  %v3462_v27 = vld [vmem:[%s4218_s1 + $0x208] sm:$0xff]   ;;  %v1922_v34 = vrot.slane %v1921_v19, 4  ;;  %v1987_v41 = vrot.slane %v1985_v26, 4 }
  0xa0   : > { %3256 = vmatpush3.bf16.msra.mxu0 %v3452_v21  ;;  %3248 = vmatmul.mubr.bf16.gmra.mxu1 %v3455_v39  ;;  %v1935_v21 = vor.u32 %v1934_v5, %v1931_v4  ;;  %v1973_v39 = vrot.slane %v1971_v24, 4  ;;  %v3469_v5 = vld [vmem:[%s3707_s27 + $0x108] ss:$8 sps:$4 sm:$0xff]  }
  0xa1   : > { %3280 = vmatpush3.bf16.msra.mxu1 %v3453_v32  ;;  %3257 = vmatprep.subr.bf16.mxu0 %v3456_v42  ;;  %v3463_v32 = vld [vmem:[%s4220_s3 + $0x8] sm:$0xff]  }
  0xa2   : > { %3281 = vmatprep.subr.bf16.mxu1 %v3457_v43  ;;  %3291 = vmatprep.mubr.bf16.mxu1 %v3466_v49  ;;  %v1936_v36 = vrot.slane %v1935_v21, 4  ;;  %v1927_v49 = vsel %vm3779_vm2, %v1922_v34, %v1926_v35  ;;  %v1977_v52 = vor.u32 %v1976_v40, %v1973_v39 }
  0xa3   : > { %3267 = vmatprep.mubr.bf16.mxu0 %v2849_v3 }
  0xa4   : > { %3258 = vmatpush3.bf16.msra.mxu0 %v3456_v42  ;;  %v1990_v42 = vrot.slane %v1988_v31, 5  ;;  %v1941_v51 = vsel %vm3779_vm2, %v1936_v36, %v1940_v37  ;;  %v1978_v62 = vrot.slane %v1977_v52, 4 }
  0xa5   : > { %3282 = vmatpush3.bf16.msra.mxu1 %v3457_v43  ;;  %3259 = vmatprep.subr.bf16.mxu0 %v3458_v55  ;;  %v1950_v43 = vrot.slane %v1949_v28, 4  ;;  %v2850_v57 = vcombine.low %v1927_v49, %v1941_v51 }
  0xa6   : > { %3283 = vmatprep.subr.bf16.mxu1 %v3459_v61  ;;  %v1991_v53 = vor.u32 %v1990_v42, %v1987_v41  ;;  %v1983_v2 = vsel %vm3779_vm2, %v1978_v62, %v1982_v58 }
  0xa8   : > { %3260 = vmatpush3.bf16.msra.mxu0 %v3458_v55  ;;  %v1955_v55 = vsel %vm3779_vm2, %v1950_v43, %v1954_v44  ;;  %v1992_v63 = vrot.slane %v1991_v53, 4 }
  0xa9   : > { %3284 = vmatpush3.bf16.msra.mxu1 %v3459_v61  ;;  %3261 = vmatprep.subr.bf16.mxu0 %v3460_v10  ;;  %v2851_v61 = vcombine.low %v1955_v55, %v1969_v56 }
  0xaa   : > { %3285 = vmatprep.subr.bf16.mxu1 %v3461_v15  ;;  %v1997_v3 = vsel %vm3779_vm2, %v1992_v63, %v1996_v0 }
  0xab   : > { %v2852_v4 = vcombine.low %v1983_v2, %v1997_v3 }
  0xac   : > { %3262 = vmatpush3.bf16.msra.mxu0 %v3460_v10 }
  0xad   : > { %3286 = vmatpush3.bf16.msra.mxu1 %v3461_v15  ;;  %3263 = vmatprep.subr.bf16.mxu0 %v3462_v27 }
  0xae   : > { %3287 = vmatprep.subr.bf16.mxu1 %v3463_v32 }
  0xb0   : > { %3264 = vmatpush3.bf16.msra.mxu0 %v3462_v27 }
  0xb1   : > { %3288 = vmatpush3.bf16.msra.mxu1 %v3463_v32  ;;  %3265 = vmatprep.subr.bf16.mxu0 %v3464_v33 }
  0xb2   : > { %3289 = vmatprep.subr.bf16.mxu1 %v3465_v48 }
  0xb4   : > { %3266 = vmatpush3.bf16.msra.mxu0 %v3464_v33 }
  0xb5   : > { %3290 = vmatpush3.bf16.msra.mxu1 %v3465_v48 }
  0xb7   : > { %3268 = vmatmul.mubr.bf16.vlgmr.msra.gmra.mxu0 %v2850_v57 }
  0xb8   : > { %3292 = vmatmul.mubr.bf16.vlgmr.msra.gmra.mxu1 %v3467_v60  ;;  %3271 = vmatprep.mubr.bf16.mxu0 %v2851_v61 }
  0xb9   : > { %3295 = vmatprep.mubr.bf16.mxu1 %v3468_v1 }
  0xbf   : > { %3272 = vmatmul.mubr.bf16.gmra.mxu0 %v2852_v4 }
  0xc0   : > { %3296 = vmatmul.mubr.bf16.gmra.mxu1 %v3469_v5 }
  0xf7   : > { %v3077_v6 = vpop.f32.mrf.mxu0 }
  0xf8   : > { %v3101_v8 = vpop.f32.mrf.mxu1 }
  0xf9   : > { %v442_v7 = vpop.f32.mrf.mxu0  ;;  %v588_v58 = vadd.f32 %v3101_v8, %v3077_v6 }
  0xfa   : > { %v579_v10 = vpop.f32.mrf.mxu1 }
  0xfb   : > { %v3078_v9 = vpop.f32.mrf.mxu0  ;;  %v580_v62 = vadd.f32 %v579_v10, %v442_v7 }
  0xfc   : > { %v3102_v13 = vpop.f32.mrf.mxu1 }
  0xfd   : > { %v445_v11 = vpop.f32.mrf.mxu0  ;;  %v591_v0 = vadd.f32 %v3102_v13, %v3078_v9 }
  0xfe   : > { %v582_v15 = vpop.f32.mrf.mxu1 }
  0xff   : > { %v3081_v12 = vpop.f32.mrf.mxu0  ;;  %v583_v4 = vadd.f32 %v582_v15, %v445_v11 }
 0x100   : > { %v3105_v16 = vpop.f32.mrf.mxu1 }
 0x101   : > { %v458_v14 = vpop.f32.mrf.mxu0 }
 0x102   : > { %v595_v59 = vpop.f32.mrf.mxu1 }
 0x103   : > { %v4052_v17 = vpop.f32.mrf.mxu0 }
 0x104   : > { %4228 = vst [vmem:[#allocation8_spill] sm:$0xff] %v4052_v17  ;;  %v3106_v20 = vpop.f32.mrf.mxu1 }
 0x105   : > { %v4054_v18 = vpop.f32.mrf.mxu0 }
 0x106   : > { %4229 = vst [vmem:[#allocation9_spill] sm:$0xff] %v4054_v18  ;;  %v4056_v22 = vpop.f32.mrf.mxu1 }
 0x107   : > { %4230 = vst [vmem:[#allocation10_spill] sm:$0xff] %v4056_v22 }
 0x10b   : > { %v4236_v13 = vld [vmem:[#allocation8_spill] sm:$0xff] }
 0x10d   : > { %v4237_v15 = vld [vmem:[#allocation9_spill] sm:$0xff] }
 0x117   : > { %v3125_v19 = vpop.f32.mrf.mxu0 }
 0x118   : > { %v3149_v23 = vpop.f32.mrf.mxu1  ;;  %v889_v63 = vadd.f32 %v3125_v19, %v588_v58  ;;  %v607_v19 = vadd.f32 %v3106_v20, %v4236_v13 }
 0x119   : > { %v856_v21 = vpop.f32.mrf.mxu0 }
 0x11a   : > { %v1029_v25 = vpop.f32.mrf.mxu1  ;;  %v887_v1 = vadd.f32 %v856_v21, %v580_v62  ;;  %v1062_v5 = vadd.f32 %v3149_v23, %v889_v63  ;;  %v4238_v23 = vld [vmem:[#allocation10_spill] sm:$0xff] }
 0x11b   : > { %v3126_v24 = vpop.f32.mrf.mxu0 }
 0x11c   : > { %v3150_v27 = vpop.f32.mrf.mxu1 }
 0x11d   : > { %v859_v26 = vpop.f32.mrf.mxu0 }
 0x11e   : > { %v1032_v29 = vpop.f32.mrf.mxu1  ;;  %v888_v22 = vadd.f32 %v859_v26, %v583_v4 }
 0x11f   : > { %v3129_v28 = vpop.f32.mrf.mxu0 }
 0x120   : > { %v3153_v31 = vpop.f32.mrf.mxu1  ;;  %v1061_v21 = vadd.f32 %v1032_v29, %v888_v22 }
 0x121   : > { %v872_v30 = vpop.f32.mrf.mxu0 }
 0x122   : > { %v1045_v33 = vpop.f32.mrf.mxu1 }
 0x123   : > { %v3130_v32 = vpop.f32.mrf.mxu0 }
 0x124   : > { %v4058_v35 = vpop.f32.mrf.mxu1 }
 0x125   : > { %v875_v34 = vpop.f32.mrf.mxu0  ;;  %4231 = vst [vmem:[#allocation11_spill] sm:$0xff] %v4058_v35  ;;  %v1060_v35 = vadd.f32 %v1029_v25, %v887_v1 }
 0x126   : > { %v4060_v37 = vpop.f32.mrf.mxu1 }
 0x127   : > { %4232 = vst [vmem:[#allocation12_spill] sm:$0xff] %v4060_v37  ;;  %v596_v37 = vadd.f32 %v595_v59, %v458_v14 }
 0x129   : > { %v891_v7 = vadd.f32 %v872_v30, %v596_v37 }
 0x12c   : > { %v4239_v20 = vld [vmem:[#allocation11_spill] sm:$0xff] }
 0x137   : > { %v3173_v36 = vpop.f32.mrf.mxu0 }
 0x138   : > { %v3197_v39 = vpop.f32.mrf.mxu1  ;;  %v1235_v18 = vadd.f32 %v3173_v36, %v1062_v5 }
 0x139   : > { %v1202_v38 = vpop.f32.mrf.mxu0 }
 0x13a   : > { %v1484_v41 = vpop.f32.mrf.mxu1  ;;  %v1233_v10 = vadd.f32 %v1202_v38, %v1060_v35  ;;  %v1517_v58 = vadd.f32 %v3197_v39, %v1235_v18 }
 0x13b   : > { %v3174_v40 = vpop.f32.mrf.mxu0 }
 0x13c   : > { %v3198_v43 = vpop.f32.mrf.mxu1  ;;  %v1515_v59 = vadd.f32 %v1484_v41, %v1233_v10 }
 0x13d   : > { %v1205_v42 = vpop.f32.mrf.mxu0 }
 0x13e   : > { %v1487_v45 = vpop.f32.mrf.mxu1  ;;  %v1234_v25 = vadd.f32 %v1205_v42, %v1061_v21 }
 0x13f   : > { %v3177_v44 = vpop.f32.mrf.mxu0 }
 0x140   : > { %v3201_v46 = vpop.f32.mrf.mxu1  ;;  %v1516_v18 = vadd.f32 %v1487_v45, %v1234_v25 }
 0x141   : > { %v1218_v47 = vpop.f32.mrf.mxu0 }
 0x142   : > { %v1500_v48 = vpop.f32.mrf.mxu1 }
 0x143   : > { %v3178_v49 = vpop.f32.mrf.mxu0 }
 0x144   : > { %v4062_v50 = vpop.f32.mrf.mxu1 }
 0x145   : > { %4233 = vst [vmem:[#allocation13_spill] sm:$0xff] %v4062_v50  ;;  %v4064_v51 = vpop.f32.mrf.mxu0  ;;  %v890_v50 = vadd.f32 %v3126_v24, %v591_v0  ;;  %v599_v24 = vadd.f32 %v4238_v23, %v4237_v15 }
 0x146   : > { %4234 = vst [vmem:[#allocation14_spill] sm:$0xff] %v4064_v51  ;;  %v4066_v53 = vpop.f32.mrf.mxu1 }
 0x147   : > { %4235 = vst [vmem:[#allocation15_spill] sm:$0xff] %v4066_v53  ;;  %v604_v53 = vadd.f32 %v3105_v16, %v3081_v12  ;;  %v1063_v17 = vadd.f32 %v3150_v27, %v890_v50  ;;  %v894_v12 = vadd.f32 %v3130_v32, %v607_v19  ;;  %v1064_v16 = vadd.f32 %v1045_v33, %v891_v7  ;;  %v4240_v32 = vld [vmem:[#allocation12_spill] sm:$0xff] }
 0x148   : > { %v892_v27 = vadd.f32 %v875_v34, %v599_v24 }
 0x149   : > { %v893_v6 = vadd.f32 %v3129_v28, %v604_v53  ;;  %v1236_v11 = vadd.f32 %v3174_v40, %v1063_v17  ;;  %v1237_v36 = vadd.f32 %v1218_v47, %v1064_v16  ;;  %v1067_v22 = vadd.f32 %v4239_v20, %v894_v12  ;;  %v4080_v47 = vld [vmem:[%s4221_s4] ss:$0 sm:$0xff] }
 0x14a   : > { %v1065_v39 = vadd.f32 %v4240_v32, %v892_v27 }
 0x14b   : > { %v1066_v62 = vadd.f32 %v3153_v31, %v893_v6  ;;  %v1518_v35 = vadd.f32 %v3198_v43, %v1236_v11  ;;  %v1240_v40 = vadd.f32 %v3178_v49, %v1067_v22  ;;  %v1519_v42 = vadd.f32 %v1500_v48, %v1237_v36 }
 0x14d   : > { %v1239_v30 = vadd.f32 %v3177_v44, %v1066_v62  ;;  %v4241_v45 = vld [vmem:[#allocation14_spill] sm:$0xff] }
 0x14e   : > { %v4243_v6 = vld [vmem:[#allocation15_spill] sm:$0xff] }
 0x14f   : > { %v1521_v33 = vadd.f32 %v3201_v46, %v1239_v30  ;;  %v4089_v46 = vld [vmem:[%s4219_s2] ss:$0 sm:$0xff] }
 0x157   : > { %v3221_v52 = vpop.f32.mrf.mxu0 }
 0x158   : > { %v3245_v54 = vpop.f32.mrf.mxu1  ;;  %v1691_v26 = vadd.f32 %v3221_v52, %v1517_v58  ;;  %v1238_v52 = vadd.f32 %v4241_v45, %v1065_v39 }
 0x159   : > { %v1658_v55 = vpop.f32.mrf.mxu0 }
 0x15a   : > { %v1831_v56 = vpop.f32.mrf.mxu1  ;;  %v1689_v37 = vadd.f32 %v1658_v55, %v1515_v59  ;;  %v1864_v29 = vadd.f32 %v3245_v54, %v1691_v26  ;;  %v1520_v7 = vadd.f32 %v4243_v6, %v1238_v52 }
 0x15b   : > { %v3222_v57 = vpop.f32.mrf.mxu0 }
 0x15c   : > { %v3246_v60 = vpop.f32.mrf.mxu1  ;;  %v1692_v38 = vadd.f32 %v3222_v57, %v1518_v35  ;;  %v1862_v50 = vadd.f32 %v1831_v56, %v1689_v37  ;;  %v4242_v57 = vld [vmem:[#allocation13_spill] sm:$0xff] }
 0x15d   : > { %v1661_v61 = vpop.f32.mrf.mxu0 }
 0x15e   : > { %v4068_v2 = vpop.f32.mrf.mxu1  ;;  %v1690_v34 = vadd.f32 %v1661_v61, %v1516_v18  ;;  %v1865_v49 = vadd.f32 %v3246_v60, %v1692_v38  ;;  %v1522_v61 = vadd.f32 %v4242_v57, %v1240_v40 }
 0x15f   : > { %v3225_v3 = vpop.f32.mrf.mxu0 }
 0x160   : > { %v4070_v51 = vpop.f32.mrf.mxu1  ;;  %v1695_v53 = vadd.f32 %v3225_v3, %v1521_v33  ;;  %v1863_v1 = vadd.f32 %v4068_v2, %v1690_v34 }
 0x161   : > { %v1674_v8 = vpop.f32.mrf.mxu0 }
 0x162   : > { %v1847_v9 = vpop.f32.mrf.mxu1  ;;  %v1693_v54 = vadd.f32 %v1674_v8, %v1519_v42  ;;  %v1868_v10 = vadd.f32 %v4070_v51, %v1695_v53 }
 0x163   : > { %v3226_v14 = vpop.f32.mrf.mxu0 }
 0x164   : > { %v3250_v28 = vpop.f32.mrf.mxu1  ;;  %v1696_v60 = vadd.f32 %v3226_v14, %v1522_v61  ;;  %v1866_v19 = vadd.f32 %v1847_v9, %v1693_v54 }
 0x165   : > { %v1677_v17 = vpop.f32.mrf.mxu0 }
 0x166   : > { %v1850_v31 = vpop.f32.mrf.mxu1  ;;  %v1694_v15 = vadd.f32 %v1677_v17, %v1520_v7  ;;  %v1869_v25 = vadd.f32 %v3250_v28, %v1696_v60 }
 0x168   : > { %v1867_v28 = vadd.f32 %v1850_v31, %v1694_v15 }
 0x177   : > { %v3269_v41 = vpop.f32.mrf.mxu0 }
 0x178   : > { %v2146_v44 = vadd.f32 %v3269_v41, %v1864_v29  ;;  %v3293_v43 = vpop.f32.mrf.mxu1 }
 0x179   : > { %v2113_v48 = vpop.f32.mrf.mxu0  ;;  %v2337_v63 = vadd.f32 %v3293_v43, %v4080_v47 }
 0x17a   : > { %v2144_v55 = vadd.f32 %v2113_v48, %v1862_v50  ;;  %v2328_v56 = vpop.f32.mrf.mxu1  ;;  %v2161_v3 = vadd.f32 %v4089_v46, %v2146_v44 }
 0x17b   : > { %v3270_v0 = vpop.f32.mrf.mxu0  ;;  %v2329_v23 = vadd.f32 %v4080_v47, %v2328_v56 }
 0x17c   : > { %v2147_v4 = vadd.f32 %v3270_v0, %v1865_v49  ;;  %v3294_v5 = vpop.f32.mrf.mxu1  ;;  %v2159_v21 = vadd.f32 %v4089_v46, %v2144_v55  ;;  %v2169_v51 = vmax.f32 %v2161_v3, 0.0 }
 0x17d   : > { %v2340_v8 = vadd.f32 %v3294_v5, %v4080_v47  ;;  %v2116_v13 = vpop.f32.mrf.mxu0 }
 0x17e   : > { %v2162_v58 = vadd.f32 %v4089_v46, %v2147_v4  ;;  %v2145_v11 = vadd.f32 %v2116_v13, %v1863_v1  ;;  %v2331_v2 = vpop.f32.mrf.mxu1  ;;  %v2167_v30 = vmax.f32 %v2159_v21, 0.0 }
 0x17f   : > { %v2921_v24 = vpack.c.bf16 %v2340_v8, %v2337_v63  ;;  %v2332_v62 = vadd.f32 %v4080_v47, %v2331_v2  ;;  %v3273_v12 = vpop.f32.mrf.mxu0 }
 0x180   : > { %v2170_v14 = vmax.f32 %v2162_v58, 0.0  ;;  %v2160_v16 = vadd.f32 %v4089_v46, %v2145_v11  ;;  %v2150_v59 = vadd.f32 %v3273_v12, %v1868_v10  ;;  %v3297_v9 = vpop.f32.mrf.mxu1 }
 0x181   : > { %2936 = vst [vmem:[%s4106_s30 + $0x8] sm:$0xff] %v2921_v24   ;;  %v2916_v26 = vpack.c.bf16 %v2332_v62, %v2329_v23  ;;  %v2129_v27 = vpop.f32.mrf.mxu0  ;;  %v2353_v22 = vadd.f32 %v3297_v9, %v4080_v47 }
 0x182   : > { %v2901_v35 = vpack.c.bf16 %v2170_v14, %v2169_v51  ;;  %v2168_v36 = vmax.f32 %v2160_v16, 0.0  ;;  %v2148_v37 = vadd.f32 %v2129_v27, %v1866_v19  ;;  %v2344_v20 = vpop.f32.mrf.mxu1  ;;  %v2165_v29 = vadd.f32 %v4089_v46, %v2150_v59 }
 0x183   : > { %2917 = vst [vmem:[%s4106_s30] sm:$0xff] %v2916_v26   ;;  %v3274_v17 = vpop.f32.mrf.mxu0  ;;  %v2345_v50 = vadd.f32 %v4080_v47, %v2344_v20 }
 0x184   : > { %2933 = vst [vmem:[%s4113_s11 + $0x8] sm:$0xff] %v2901_v35   ;;  %v2896_v18 = vpack.c.bf16 %v2168_v36, %v2167_v30  ;;  %v2151_v38 = vadd.f32 %v3274_v17, %v1869_v25  ;;  %v3298_v32 = vpop.f32.mrf.mxu1  ;;  %v2163_v31 = vadd.f32 %v4089_v46, %v2148_v37  ;;  %v2173_v43 = vmax.f32 %v2165_v29, 0.0 }
 0x185   : > { %v2356_v39 = vadd.f32 %v3298_v32, %v4080_v47  ;;  %v2132_v33 = vpop.f32.mrf.mxu0 }
 0x186   : > { %2897 = vst [vmem:[%s4113_s11] sm:$0xff] %v2896_v18   ;;  %v2166_v40 = vadd.f32 %v4089_v46, %v2151_v38  ;;  %v2149_v41 = vadd.f32 %v2132_v33, %v1867_v28  ;;  %v2347_v42 = vpop.f32.mrf.mxu1  ;;  %v2171_v48 = vmax.f32 %v2163_v31, 0.0 }
 0x187   : > { %v2931_v34 = vpack.c.bf16 %v2356_v39, %v2353_v22  ;;  %v2348_v44 = vadd.f32 %v4080_v47, %v2347_v42 }
 0x188   : > { %v2174_v45 = vmax.f32 %v2166_v40, 0.0  ;;  %v2164_v52 = vadd.f32 %v4089_v46, %v2149_v41 }
 0x189   : > { %2938 = vst [vmem:[%s4106_s30 + $0x18] sm:$0xff] %v2931_v34   ;;  %v2926_v53 = vpack.c.bf16 %v2348_v44, %v2345_v50 }
 0x18a   : > { %v2911_v49 = vpack.c.bf16 %v2174_v45, %v2173_v43  ;;  %v2172_v47 = vmax.f32 %v2164_v52, 0.0 }
 0x18b   : > { %2937 = vst [vmem:[%s4106_s30 + $0x10] sm:$0xff] %v2926_v53  }
 0x18c   : > { %2935 = vst [vmem:[%s4113_s11 + $0x18] sm:$0xff] %v2911_v49   ;;  %v2906_v46 = vpack.c.bf16 %v2172_v47, %v2171_v48 }
 0x18d   : > { %3483 = shalt.err (!%p3480_p5)
}
 0x18e   : > { %s3484_s30 = scalar_lea.hbm %s4133_s16, 512  ;;  %s3488_s27 = scalar_lea.hbm %s4223_s6, 1024 }
 0x18f   : > { %p3485_p6 = scmp.ne.s32.totalorder %s4133_s16, %s3484_s30  ;;  %p3489_p10 = scmp.lt.s32.totalorder %s4133_s16, %s4223_s6 }
 0x190   : > { %p3490_p11 = scmp.lt.s32.totalorder %s3488_s27, %s3484_s30 }
 0x191   : > { %p3486_p7 = pnand %p3485_p6, %p3657_p4 }
 0x192   : > { %p3491_p12 = por %p3490_p11, %p3489_p10 }
 0x193   : > { %p3487_p9 = pneg %p3486_p7 }
 0x195   : > { %p3492_p13 = pnand %p3491_p12, %p3487_p9 }
 0x197   : > { %3495 = shalt.err (!%p3492_p13)
}
 0x198   : > { %s3579_s28 = smov 64   ;;  %s3580_s24 = smov 4   ;;  %2934 = vst [vmem:[%s4113_s11 + $0x10] sm:$0xff] %v2906_v46  }
 0x199   : > { %s4244_s20 = scalar_lea.sflag [#allocation5], %s4083_s19  ;;  %s2376_s15 = scalar_lea.sflag [#allocation3], %s4083_s19 }
 0x19a   : > { %3301 = dma.vmem_to_hbm [thread:$0]  (%p3657_p4), %s4126_s12, 512, %s4133_s16, %s4244_s20, %s3579_s28, %s3579_s28, %s3580_s24  }
 0x19b   : > { %s3496_s30 = scalar_lea.vmem %s4141_s14, 512  ;;  %s3581_s13 = smov [#allocation2]  }
 0x19c   : > { %p3497_p0 = scmp.ne.s32.totalorder %s4141_s14, %s3496_s30  ;;  %s3500_s17 = sshll.u32 %s3581_s13, 4  ;;  %s3501_s17 = int_to_ptr.vmem [resolvable:$false] %s3500_s17 }
 0x19d   : > { %s3502_s27 = scalar_lea.vmem %s3501_s17, 1024  ;;  %p3503_p3 = scmp.lt.s32.totalorder %s4141_s14, %s3501_s17 }
 0x19e   : > { %p3498_p1 = pnand %p3497_p0, %p3657_p4  ;;  %p3504_p5 = scmp.lt.s32.totalorder %s3502_s27, %s3496_s30 }
 0x1a0   : > { %p3499_p2 = pneg %p3498_p1  ;;  %p3505_p6 = por %p3504_p5, %p3503_p3 }
 0x1a2   : > { %p3506_p7 = pnand %p3505_p6, %p3499_p2 }
 0x1a4   : > { %3509 = shalt.err (!%p3506_p7)
}
 0x1a5   : > { %s3510_s11 = scalar_lea.hbm %s4139_s18, 512  ;;  %s3514_s16 = scalar_lea.hbm %s4222_s5, 1024 }
 0x1a6   : > { %p3511_p9 = scmp.ne.s32.totalorder %s4139_s18, %s3510_s11  ;;  %p3515_p12 = scmp.lt.s32.totalorder %s4139_s18, %s4222_s5 }
 0x1a7   : > { %p3516_p13 = scmp.lt.s32.totalorder %s3514_s16, %s3510_s11 }
 0x1a8   : > { %p3512_p10 = pnand %p3511_p9, %p3657_p4 }
 0x1a9   : > { %p3517_p0 = por %p3516_p13, %p3515_p12 }
 0x1aa   : > { %p3513_p11 = pneg %p3512_p10 }
 0x1ac   : > { %p3518_p1 = pnand %p3517_p0, %p3513_p11 }
 0x1ae   : > { %3521 = shalt.err (!%p3518_p1)
}
 0x1af   : > { %3300 = dma.vmem_to_hbm [thread:$0]  (%p3657_p4), %s4141_s14, 512, %s4139_s18, %s2376_s15, %s3579_s28, %s3579_s28, %s3580_s24  }
 0x1b0 PF: > { %p3311_p2 = scmp.ge.s32.totalorder %s3576_s26, 2  ;;  %s2429_s30 = sand.u32 1, %s3556_s21  }
 0x1b1   : > { %s2430_s13 = scalar_lea.sflag [#allocation3], %s2429_s30 }
 0x1b2   : > { %p3305_p3 = pnand %p3311_p2, %p3664_p8 }
 0x1b4   : > { %p3306_p5 = pneg %p3305_p3 }
 0x1b6   : > { %3547 = dma.done.wait (%p3306_p5), %s2430_s13, 512  }
 0x1b7   : > { %3549 = vsyncadd (%p3306_p5), %s2430_s13, 4294966784  ;;  %s2439_s17 = scalar_lea.sflag [#allocation5], %s2429_s30 }
 0x1b8   : > { %3551 = dma.done.wait (%p3306_p5), %s2439_s17, 512  }
 0x1b9   : > { %3553 = vsyncadd (%p3306_p5), %s2439_s17, 4294966784  ;;  %s23_s26 = sadd.s32 1, %s3576_s26   ;;  %s4245_s21 = smov %s3560_s22 }
 0x1ba   : > { %p20_p6 = scmp.ge.s32.totalorder %s23_s26, 4   ;;  %s4246_s22 = smov %s3564_s23 }
 0x1bb   : > { %s4247_s23 = smov %s3670_s10  ;;  %s4248_s24 = smov %s3572_s25 }
 0x1bc   : > { %s4249_s25 = smov %s4251_s29  ;;  %22 = sbr.rel (!%p20_p6) target bundleno = 6 (0x6), region = 106 }
 0x1c1   :  { %2444 = vsyncpa [#allocation3], 1 }
 0x1c2   :  { %2446 = vsyncpa [#allocation3 + $0x1], 1 }
 0x1c3   :  { %2447 = vsyncpa [#allocation5], 1 }
 0x1c4   :  { %2449 = vsyncpa [#allocation5 + $0x1], 1 }

</bundles_post_ra>
